<compile_context>
chip_gen: v7x
topology: tpu7x:2x2x1
jax: 0.10.0
libtpu: 0.0.40
codegen_flags: <defaults>
</compile_context>

<pallas_src>
import functools

import jax
import jax.numpy as jnp
from jax.experimental import pallas as pl
from jax.experimental.pallas import tpu as pltpu


# ----------------------------- Pallas kernel ------------------------------- #

def _matmul_bias_act_kernel(a_ref, w_ref, b_ref, o_ref, *, act):
    # a: (TM, K) bf16, w: (K, N) bf16, b: (1, N) f32, o: (TM, N) f32/bf16
    acc = jnp.dot(a_ref[...], w_ref[...], preferred_element_type=jnp.float32)
    acc = acc + b_ref[...]
    if act == "relu":
        acc = jnp.maximum(acc, 0.0)
    elif act == "sigmoid":
        # exp lands on the EUP slot; exact divide keeps outputs in [0, 1]
        acc = 1.0 / (1.0 + jnp.exp(-acc))
    o_ref[...] = acc.astype(o_ref.dtype)


def matmul_bias_act(a, w, b, act, *, out_dtype=jnp.float32, tm=512):
    """out = act(a @ w + b) on the MXU, M-tiled and pipelined.

    a: (M, K), w: (K, N), b: (N,).  bf16 MXU inputs, f32 epilogue,
    `out_dtype` stores (bf16 for intermediate layers, f32 for the last).
    """
    M, K = a.shape
    K2, N = w.shape
    assert K == K2 and b.shape == (N,)

    a = a.astype(jnp.bfloat16)
    w = w.astype(jnp.bfloat16)
    b2 = b.reshape(1, N).astype(jnp.float32)

    # Small layers stay a single invocation; big ones tile along M.
    block_m = M if M <= tm else tm
    grid = (pl.cdiv(M, block_m),)

    kernel = functools.partial(_matmul_bias_act_kernel, act=act)
    return pl.pallas_call(
        kernel,
        out_shape=jax.ShapeDtypeStruct((M, N), out_dtype),
        grid=grid,
        in_specs=[
            pl.BlockSpec((block_m, K), lambda i: (i, 0)),
            pl.BlockSpec((K, N), lambda i: (0, 0)),
            pl.BlockSpec((1, N), lambda i: (0, 0)),
        ],
        out_specs=pl.BlockSpec((block_m, N), lambda i: (i, 0)),
        compiler_params=pltpu.CompilerParams(
            dimension_semantics=("parallel",),
        ),
    )(a, w, b2)


# ------------------------------ conv layers --------------------------------- #

def conv2d_s2_nhwc(x, w, b, act, *, out_dtype=jnp.float32):
    """PyTorch Conv2d(k=3, stride=2, padding=1) on NHWC activations.

    x: (N, H, W, Cin), w: (Cout, Cin, 3, 3) (PyTorch layout), b: (Cout,).
    """
    N, H, W, Cin = x.shape
    Cout, Cin2, k, _ = w.shape
    assert Cin == Cin2
    stride, pad = 2, 1

    xp = jnp.pad(x, ((0, 0), (pad, pad), (pad, pad), (0, 0)))
    Hp, Wp = H + 2 * pad, W + 2 * pad
    OH = (Hp - k) // stride + 1
    OW = (Wp - k) // stride + 1

    # TODO(synk): for large spatial sizes move patch extraction into the Pallas
    # kernel (9 shifted strided loads accumulated in VMEM) to avoid the im2col
    # matrix in HBM; at these shapes the matrix is tiny.
    taps = []
    for ky in range(k):
        for kx in range(k):
            taps.append(xp[:, ky:ky + stride * (OH - 1) + 1:stride,
                            kx:kx + stride * (OW - 1) + 1:stride, :])
    patches = jnp.stack(taps, axis=3).reshape(N * OH * OW, k * k * Cin)
    wm = w.transpose(2, 3, 1, 0).reshape(k * k * Cin, Cout)

    out = matmul_bias_act(patches, wm, b, act, out_dtype=out_dtype)
    return out.reshape(N, OH, OW, Cout)


def conv_transpose2d_s2_nhwc(x, w, b, act, *, out_dtype=jnp.float32):
    """PyTorch ConvTranspose2d(k=3, stride=2, padding=1, output_padding=1)
    on NHWC activations.

    The 4 output-parity sub-convolutions are fused into a SINGLE matmul:
      A  = [x00 | x01 | x10 | x11]                      (M, 4*Cin)
      Wf = block-sparse tap matrix                       (4*Cin, 4*Cout)
      y  = act(A @ Wf + tile(b, 4))                      (M, 4*Cout)
    so the whole layer is one Pallas launch with a lane-dense output.

    x: (N, H, W, Cin), w: (Cin, Cout, 3, 3) (PyTorch layout), b: (Cout,).
    Output: (N, 2H, 2W, Cout).
    """
    N, H, W, Cin = x.shape
    Cin2, Cout, k, _ = w.shape
    assert Cin == Cin2 and k == 3

    # Shifted copies of x (zero beyond the boundary).
    x00 = x                                                            # x[i,   j]
    x01 = jnp.pad(x[:, :, 1:, :], ((0, 0), (0, 0), (0, 1), (0, 0)))    # x[i,   j+1]
    x10 = jnp.pad(x[:, 1:, :, :], ((0, 0), (0, 1), (0, 0), (0, 0)))    # x[i+1, j]
    x11 = jnp.pad(x[:, 1:, 1:, :], ((0, 0), (0, 1), (0, 1), (0, 0)))   # x[i+1, j+1]
    a = jnp.concatenate([x00, x01, x10, x11], axis=-1).reshape(N * H * W, 4 * Cin)

    def tap(ky, kx):                    # (Cin, Cout) tap matrix
        return w[:, :, ky, kx]

    z = jnp.zeros((Cin, Cout), w.dtype)
    # Column blocks = output phases (0,0), (0,1), (1,0), (1,1);
    # row blocks    = input shifts   x00,   x01,   x10,   x11.
    # y[2i+py, 2j+px] = sum over contributing (shift, tap) pairs.
    wf = jnp.block([
        [tap(1, 1), tap(1, 2), tap(2, 1), tap(2, 2)],   # x00
        [z,         tap(1, 0), z,         tap(2, 0)],   # x01
        [z,         z,         tap(0, 1), tap(0, 2)],   # x10
        [z,         z,         z,         tap(0, 0)],   # x11
    ])                                                   # (4*Cin, 4*Cout)
    bf = jnp.tile(b, 4)                                  # (4*Cout,)

    # Lane-dense output for the Cout=1 final layer: pad the fused output
    # columns to 128 inside the matmul, slice the real columns outside.
    n_real = 4 * Cout
    if n_real < 128:
        wf = jnp.pad(wf, ((0, 0), (0, 128 - n_real)))
        bf = jnp.pad(bf, (0, 128 - n_real))

    y = matmul_bias_act(a, wf, bf, act, out_dtype=out_dtype)
    y = y[:, :n_real]

    # Interleave the 4 parity grids into the full-resolution output.
    y = y.reshape(N, H, W, 2, 2, Cout)                   # (..., py, px, Cout)
    y = y.transpose(0, 1, 3, 2, 4, 5).reshape(N, 2 * H, 2 * W, Cout)
    return y


# ------------------------- parameters & forward ----------------------------- #

def _uniform(key, shape, fan_in):
    bound = 1.0 / jnp.sqrt(jnp.float32(fan_in))
    return jax.random.uniform(key, shape, jnp.float32, -bound, bound)


def init_params(key):
    ks = jax.random.split(key, 8)
    k = 3
    return {
        # encoder (Conv2d weight layout: (Cout, Cin, k, k); fan_in = Cin*k*k)
        "enc1_w": _uniform(ks[0], (64, 1, k, k), 1 * k * k),
        "enc1_b": _uniform(ks[1], (64,), 1 * k * k),
        "enc2_w": _uniform(ks[2], (128, 64, k, k), 64 * k * k),
        "enc2_b": _uniform(ks[3], (128,), 64 * k * k),
        # decoder (ConvTranspose2d weight layout: (Cin, Cout, k, k);
        #          PyTorch fan_in = out_channels*k*k)
        "dec1_w": _uniform(ks[4], (128, 64, k, k), 64 * k * k),
        "dec1_b": _uniform(ks[5], (64,), 64 * k * k),
        "dec2_w": _uniform(ks[6], (64, 1, k, k), 1 * k * k),
        "dec2_b": _uniform(ks[7], (1,), 1 * k * k),
    }


def conv_autoencoder_forward(params, x_nchw):
    x = x_nchw.transpose(0, 2, 3, 1)            # NCHW -> NHWC (once)
    # encoder (intermediate activations kept in bf16 straight from the kernel)
    h = conv2d_s2_nhwc(x, params["enc1_w"], params["enc1_b"], "relu",
                       out_dtype=jnp.bfloat16)
    h = conv2d_s2_nhwc(h, params["enc2_w"], params["enc2_b"], "relu",
                       out_dtype=jnp.bfloat16)
    # decoder
    h = conv_transpose2d_s2_nhwc(h, params["dec1_w"], params["dec1_b"], "relu",
                                 out_dtype=jnp.bfloat16)
    y = conv_transpose2d_s2_nhwc(h, params["dec2_w"], params["dec2_b"], "sigmoid",
                                 out_dtype=jnp.float32)
    return y.transpose(0, 3, 1, 2)              # NHWC -> NCHW (once)


# ------------------------- pure-JAX reference (check) ----------------------- #

def reference_forward(params, x_nchw):
    x = x_nchw.transpose(0, 2, 3, 1)
    dn = ("NHWC", "HWIO", "NHWC")

    def conv(h, w, b):
        w_h = w.transpose(2, 3, 1, 0)                        # (k,k,Cin,Cout)
        y = jax.lax.conv_general_dilated(h, w_h, (2, 2), ((1, 1), (1, 1)),
                                         dimension_numbers=dn)
        return jax.nn.relu(y + b)

    def convT(h, w, b, act):
        w_h = jnp.flip(w, axis=(2, 3)).transpose(2, 3, 0, 1)  # (k,k,Cin,Cout)
        y = jax.lax.conv_general_dilated(h, w_h, (1, 1), ((1, 2), (1, 2)),
                                         lhs_dilation=(2, 2),
                                         dimension_numbers=dn)
        y = y + b
        return jax.nn.relu(y) if act == "relu" else jax.nn.sigmoid(y)

    h = conv(x, params["enc1_w"], params["enc1_b"])
    h = conv(h, params["enc2_w"], params["enc2_b"])
    h = convT(h, params["dec1_w"], params["dec1_b"], "relu")
    y = convT(h, params["dec2_w"], params["dec2_b"], "sigmoid")
    return y.transpose(0, 3, 1, 2)


# --------------------------------- main ------------------------------------- #

if __name__ == "__main__":
    key = jax.random.PRNGKey(0)
    pkey, xkey = jax.random.split(key)
    params = init_params(pkey)

    # input: (N=2, C=1, H=16, W=16), NCHW like PyTorch
    x = jax.random.uniform(xkey, (2, 1, 16, 16), jnp.float32)

    fwd = jax.jit(conv_autoencoder_forward)
    y = fwd(params, x)
    y = jax.block_until_ready(y)

    assert y.shape == (2, 1, 16, 16), y.shape
    assert y.dtype == jnp.float32
    # sigmoid output must lie in [0, 1]
    assert bool(jnp.all(y >= 0.0)) and bool(jnp.all(y <= 1.0))

    # correctness vs a pure-JAX f32 reference (kernel uses bf16 MXU inputs)
    y_ref = jax.block_until_ready(jax.jit(reference_forward)(params, x))
    max_err = float(jnp.max(jnp.abs(y - y_ref)))
    assert max_err < 5e-2, f"max abs err vs reference: {max_err}"

    print("KERNEL_OK")
</pallas_src>

<mosaic_0001>
module attributes {stable_mosaic.version = 11 : i64} {
  func.func @_matmul_bias_act_kernel(%arg0: i32, %arg1: memref<128x9xbf16, #tpu.memory_space<vmem>>, %arg2: memref<9x64xbf16, #tpu.memory_space<vmem>>, %arg3: memref<1x64xf32, #tpu.memory_space<vmem>>, %arg4: memref<128x64xbf16, #tpu.memory_space<vmem>>) attributes {dimension_semantics = [#tpu.dimension_semantics<parallel>], iteration_bounds = array<i64: 1>, scalar_prefetch = 0 : i64, scratch_operands = 0 : i64, tpu.core_type = #tpu.core_type<tc>, window_params = [{transform_indices = @transform_0, window_bounds = array<i64: 128, 9>}, {pipeline_mode = #tpu.pipeline_mode<synchronous>, transform_indices = @transform_1, window_bounds = array<i64: 9, 64>}, {pipeline_mode = #tpu.pipeline_mode<synchronous>, transform_indices = @transform_2, window_bounds = array<i64: 1, 64>}, {transform_indices = @transform_3, window_bounds = array<i64: 128, 64>}]} {
    %c0 = arith.constant 0 : index
    %c0_0 = arith.constant 0 : index
    %0 = vector.load %arg1[%c0, %c0_0] : memref<128x9xbf16, #tpu.memory_space<vmem>>, vector<128x9xbf16>
    %c0_1 = arith.constant 0 : index
    %c0_2 = arith.constant 0 : index
    %1 = vector.load %arg2[%c0_1, %c0_2] : memref<9x64xbf16, #tpu.memory_space<vmem>>, vector<9x64xbf16>
    %cst = arith.constant dense<0.000000e+00> : vector<128x64xf32>
    %2 = tpu.matmul %0, %1, %cst {dimension_numbers = #tpu.dot_dimension_numbers<[1], [0], [0], [1], [0, 0, 1, 1], [], []>} : vector<128x9xbf16>, vector<9x64xbf16>, vector<128x64xf32> -> vector<128x64xf32>
    %c0_3 = arith.constant 0 : index
    %c0_4 = arith.constant 0 : index
    %3 = vector.load %arg3[%c0_3, %c0_4] : memref<1x64xf32, #tpu.memory_space<vmem>>, vector<1x64xf32>
    %4 = vector.broadcast %3 : vector<1x64xf32> to vector<128x64xf32>
    %5 = arith.addf %2, %4 : vector<128x64xf32>
    %cst_5 = arith.constant 0.000000e+00 : f32
    %6 = vector.broadcast %cst_5 : f32 to vector<128x64xf32>
    %7 = arith.maximumf %5, %6 : vector<128x64xf32>
    %8 = arith.truncf %7 : vector<128x64xf32> to vector<128x64xbf16>
    %c0_6 = arith.constant 0 : index
    %c0_7 = arith.constant 0 : index
    %9 = vector.load %arg4[%c0_6, %c0_7] : memref<128x64xbf16, #tpu.memory_space<vmem>>, vector<128x64xbf16>
    tpu.vector_store %arg4[%c0_6, %c0_7], %8 {strides = array<i32>} : memref<128x64xbf16, #tpu.memory_space<vmem>>, vector<128x64xbf16>,
    return
  }
  func.func @transform_0(%arg0: i32) -> (i32, i32) {
    %c0_i32 = arith.constant 0 : i32
    %c0_i32_0 = arith.constant 0 : i32
    return %arg0, %c0_i32 : i32, i32
  }
  func.func @transform_1(%arg0: i32) -> (i32, i32) {
    %c0_i32 = arith.constant 0 : i32
    %c0_i32_0 = arith.constant 0 : i32
    %c0_i32_1 = arith.constant 0 : i32
    return %c0_i32, %c0_i32_0 : i32, i32
  }
  func.func @transform_2(%arg0: i32) -> (i32, i32) {
    %c0_i32 = arith.constant 0 : i32
    %c0_i32_0 = arith.constant 0 : i32
    %c0_i32_1 = arith.constant 0 : i32
    return %c0_i32, %c0_i32_0 : i32, i32
  }
  func.func @transform_3(%arg0: i32) -> (i32, i32) {
    %c0_i32 = arith.constant 0 : i32
    %c0_i32_0 = arith.constant 0 : i32
    return %arg0, %c0_i32 : i32, i32
  }
}

module attributes {stable_mosaic.version = 11 : i64} {
  func.func @_matmul_bias_act_kernel(%arg0: i32, %arg1: memref<32x576xbf16, #tpu.memory_space<vmem>>, %arg2: memref<576x128xbf16, #tpu.memory_space<vmem>>, %arg3: memref<1x128xf32, #tpu.memory_space<vmem>>, %arg4: memref<32x128xbf16, #tpu.memory_space<vmem>>) attributes {dimension_semantics = [#tpu.dimension_semantics<parallel>], iteration_bounds = array<i64: 1>, scalar_prefetch = 0 : i64, scratch_operands = 0 : i64, tpu.core_type = #tpu.core_type<tc>, window_params = [{transform_indices = @transform_0, window_bounds = array<i64: 32, 576>}, {pipeline_mode = #tpu.pipeline_mode<synchronous>, transform_indices = @transform_1, window_bounds = array<i64: 576, 128>}, {pipeline_mode = #tpu.pipeline_mode<synchronous>, transform_indices = @transform_2, window_bounds = array<i64: 1, 128>}, {transform_indices = @transform_3, window_bounds = array<i64: 32, 128>}]} {
    %c0 = arith.constant 0 : index
    %c0_0 = arith.constant 0 : index
    %0 = vector.load %arg1[%c0, %c0_0] : memref<32x576xbf16, #tpu.memory_space<vmem>>, vector<32x576xbf16>
    %c0_1 = arith.constant 0 : index
    %c0_2 = arith.constant 0 : index
    %1 = vector.load %arg2[%c0_1, %c0_2] : memref<576x128xbf16, #tpu.memory_space<vmem>>, vector<576x128xbf16>
    %cst = arith.constant dense<0.000000e+00> : vector<32x128xf32>
    %2 = tpu.matmul %0, %1, %cst {dimension_numbers = #tpu.dot_dimension_numbers<[1], [0], [0], [1], [0, 0, 1, 1], [], []>} : vector<32x576xbf16>, vector<576x128xbf16>, vector<32x128xf32> -> vector<32x128xf32>
    %c0_3 = arith.constant 0 : index
    %c0_4 = arith.constant 0 : index
    %3 = vector.load %arg3[%c0_3, %c0_4] : memref<1x128xf32, #tpu.memory_space<vmem>>, vector<1x128xf32>
    %4 = vector.broadcast %3 : vector<1x128xf32> to vector<32x128xf32>
    %5 = arith.addf %2, %4 : vector<32x128xf32>
    %cst_5 = arith.constant 0.000000e+00 : f32
    %6 = vector.broadcast %cst_5 : f32 to vector<32x128xf32>
    %7 = arith.maximumf %5, %6 : vector<32x128xf32>
    %8 = arith.truncf %7 : vector<32x128xf32> to vector<32x128xbf16>
    %c0_6 = arith.constant 0 : index
    %c0_7 = arith.constant 0 : index
    %9 = vector.load %arg4[%c0_6, %c0_7] : memref<32x128xbf16, #tpu.memory_space<vmem>>, vector<32x128xbf16>
    tpu.vector_store %arg4[%c0_6, %c0_7], %8 {strides = array<i32>} : memref<32x128xbf16, #tpu.memory_space<vmem>>, vector<32x128xbf16>,
    return
  }
  func.func @transform_0(%arg0: i32) -> (i32, i32) {
    %c0_i32 = arith.constant 0 : i32
    %c0_i32_0 = arith.constant 0 : i32
    return %arg0, %c0_i32 : i32, i32
  }
  func.func @transform_1(%arg0: i32) -> (i32, i32) {
    %c0_i32 = arith.constant 0 : i32
    %c0_i32_0 = arith.constant 0 : i32
    %c0_i32_1 = arith.constant 0 : i32
    return %c0_i32, %c0_i32_0 : i32, i32
  }
  func.func @transform_2(%arg0: i32) -> (i32, i32) {
    %c0_i32 = arith.constant 0 : i32
    %c0_i32_0 = arith.constant 0 : i32
    %c0_i32_1 = arith.constant 0 : i32
    return %c0_i32, %c0_i32_0 : i32, i32
  }
  func.func @transform_3(%arg0: i32) -> (i32, i32) {
    %c0_i32 = arith.constant 0 : i32
    %c0_i32_0 = arith.constant 0 : i32
    return %arg0, %c0_i32 : i32, i32
  }
}

module attributes {stable_mosaic.version = 11 : i64} {
  func.func @_matmul_bias_act_kernel(%arg0: i32, %arg1: memref<32x512xbf16, #tpu.memory_space<vmem>>, %arg2: memref<512x256xbf16, #tpu.memory_space<vmem>>, %arg3: memref<1x256xf32, #tpu.memory_space<vmem>>, %arg4: memref<32x256xbf16, #tpu.memory_space<vmem>>) attributes {dimension_semantics = [#tpu.dimension_semantics<parallel>], iteration_bounds = array<i64: 1>, scalar_prefetch = 0 : i64, scratch_operands = 0 : i64, tpu.core_type = #tpu.core_type<tc>, window_params = [{transform_indices = @transform_0, window_bounds = array<i64: 32, 512>}, {pipeline_mode = #tpu.pipeline_mode<synchronous>, transform_indices = @transform_1, window_bounds = array<i64: 512, 256>}, {pipeline_mode = #tpu.pipeline_mode<synchronous>, transform_indices = @transform_2, window_bounds = array<i64: 1, 256>}, {transform_indices = @transform_3, window_bounds = array<i64: 32, 256>}]} {
    %c0 = arith.constant 0 : index
    %c0_0 = arith.constant 0 : index
    %0 = vector.load %arg1[%c0, %c0_0] : memref<32x512xbf16, #tpu.memory_space<vmem>>, vector<32x512xbf16>
    %c0_1 = arith.constant 0 : index
    %c0_2 = arith.constant 0 : index
    %1 = vector.load %arg2[%c0_1, %c0_2] : memref<512x256xbf16, #tpu.memory_space<vmem>>, vector<512x256xbf16>
    %cst = arith.constant dense<0.000000e+00> : vector<32x256xf32>
    %2 = tpu.matmul %0, %1, %cst {dimension_numbers = #tpu.dot_dimension_numbers<[1], [0], [0], [1], [0, 0, 1, 1], [], []>} : vector<32x512xbf16>, vector<512x256xbf16>, vector<32x256xf32> -> vector<32x256xf32>
    %c0_3 = arith.constant 0 : index
    %c0_4 = arith.constant 0 : index
    %3 = vector.load %arg3[%c0_3, %c0_4] : memref<1x256xf32, #tpu.memory_space<vmem>>, vector<1x256xf32>
    %4 = vector.broadcast %3 : vector<1x256xf32> to vector<32x256xf32>
    %5 = arith.addf %2, %4 : vector<32x256xf32>
    %cst_5 = arith.constant 0.000000e+00 : f32
    %6 = vector.broadcast %cst_5 : f32 to vector<32x256xf32>
    %7 = arith.maximumf %5, %6 : vector<32x256xf32>
    %8 = arith.truncf %7 : vector<32x256xf32> to vector<32x256xbf16>
    %c0_6 = arith.constant 0 : index
    %c0_7 = arith.constant 0 : index
    %9 = vector.load %arg4[%c0_6, %c0_7] : memref<32x256xbf16, #tpu.memory_space<vmem>>, vector<32x256xbf16>
    tpu.vector_store %arg4[%c0_6, %c0_7], %8 {strides = array<i32>} : memref<32x256xbf16, #tpu.memory_space<vmem>>, vector<32x256xbf16>,
    return
  }
  func.func @transform_0(%arg0: i32) -> (i32, i32) {
    %c0_i32 = arith.constant 0 : i32
    %c0_i32_0 = arith.constant 0 : i32
    return %arg0, %c0_i32 : i32, i32
  }
  func.func @transform_1(%arg0: i32) -> (i32, i32) {
    %c0_i32 = arith.constant 0 : i32
    %c0_i32_0 = arith.constant 0 : i32
    %c0_i32_1 = arith.constant 0 : i32
    return %c0_i32, %c0_i32_0 : i32, i32
  }
  func.func @transform_2(%arg0: i32) -> (i32, i32) {
    %c0_i32 = arith.constant 0 : i32
    %c0_i32_0 = arith.constant 0 : i32
    %c0_i32_1 = arith.constant 0 : i32
    return %c0_i32, %c0_i32_0 : i32, i32
  }
  func.func @transform_3(%arg0: i32) -> (i32, i32) {
    %c0_i32 = arith.constant 0 : i32
    %c0_i32_0 = arith.constant 0 : i32
    return %arg0, %c0_i32 : i32, i32
  }
}

module attributes {stable_mosaic.version = 11 : i64} {
  func.func @_matmul_bias_act_kernel(%arg0: i32, %arg1: memref<128x256xbf16, #tpu.memory_space<vmem>>, %arg2: memref<256x128xbf16, #tpu.memory_space<vmem>>, %arg3: memref<1x128xf32, #tpu.memory_space<vmem>>, %arg4: memref<128x128xf32, #tpu.memory_space<vmem>>) attributes {dimension_semantics = [#tpu.dimension_semantics<parallel>], iteration_bounds = array<i64: 1>, scalar_prefetch = 0 : i64, scratch_operands = 0 : i64, tpu.core_type = #tpu.core_type<tc>, window_params = [{transform_indices = @transform_0, window_bounds = array<i64: 128, 256>}, {pipeline_mode = #tpu.pipeline_mode<synchronous>, transform_indices = @transform_1, window_bounds = array<i64: 256, 128>}, {pipeline_mode = #tpu.pipeline_mode<synchronous>, transform_indices = @transform_2, window_bounds = array<i64: 1, 128>}, {transform_indices = @transform_3, window_bounds = array<i64: 128, 128>}]} {
    %c0 = arith.constant 0 : index
    %c0_0 = arith.constant 0 : index
    %0 = vector.load %arg1[%c0, %c0_0] : memref<128x256xbf16, #tpu.memory_space<vmem>>, vector<128x256xbf16>
    %c0_1 = arith.constant 0 : index
    %c0_2 = arith.constant 0 : index
    %1 = vector.load %arg2[%c0_1, %c0_2] : memref<256x128xbf16, #tpu.memory_space<vmem>>, vector<256x128xbf16>
    %cst = arith.constant dense<0.000000e+00> : vector<128x128xf32>
    %2 = tpu.matmul %0, %1, %cst {dimension_numbers = #tpu.dot_dimension_numbers<[1], [0], [0], [1], [0, 0, 1, 1], [], []>} : vector<128x256xbf16>, vector<256x128xbf16>, vector<128x128xf32> -> vector<128x128xf32>
    %c0_3 = arith.constant 0 : index
    %c0_4 = arith.constant 0 : index
    %3 = vector.load %arg3[%c0_3, %c0_4] : memref<1x128xf32, #tpu.memory_space<vmem>>, vector<1x128xf32>
    %4 = vector.broadcast %3 : vector<1x128xf32> to vector<128x128xf32>
    %5 = arith.addf %2, %4 : vector<128x128xf32>
    %cst_5 = arith.constant 0.000000e+00 : f32
    %6 = vector.broadcast %cst_5 : f32 to vector<128x128xf32>
    %7 = arith.subf %6, %5 : vector<128x128xf32>
    %8 = math.exp %7 : vector<128x128xf32>
    %cst_6 = arith.constant 1.000000e+00 : f32
    %9 = vector.broadcast %cst_6 : f32 to vector<128x128xf32>
    %10 = arith.addf %9, %8 : vector<128x128xf32>
    %cst_7 = arith.constant 1.000000e+00 : f32
    %11 = vector.broadcast %cst_7 : f32 to vector<128x128xf32>
    %12 = arith.divf %11, %10 : vector<128x128xf32>
    %c0_8 = arith.constant 0 : index
    %c0_9 = arith.constant 0 : index
    %13 = vector.load %arg4[%c0_8, %c0_9] : memref<128x128xf32, #tpu.memory_space<vmem>>, vector<128x128xf32>
    tpu.vector_store %arg4[%c0_8, %c0_9], %12 {strides = array<i32>} : memref<128x128xf32, #tpu.memory_space<vmem>>, vector<128x128xf32>,
    return
  }
  func.func @transform_0(%arg0: i32) -> (i32, i32) {
    %c0_i32 = arith.constant 0 : i32
    %c0_i32_0 = arith.constant 0 : i32
    return %arg0, %c0_i32 : i32, i32
  }
  func.func @transform_1(%arg0: i32) -> (i32, i32) {
    %c0_i32 = arith.constant 0 : i32
    %c0_i32_0 = arith.constant 0 : i32
    %c0_i32_1 = arith.constant 0 : i32
    return %c0_i32, %c0_i32_0 : i32, i32
  }
  func.func @transform_2(%arg0: i32) -> (i32, i32) {
    %c0_i32 = arith.constant 0 : i32
    %c0_i32_0 = arith.constant 0 : i32
    %c0_i32_1 = arith.constant 0 : i32
    return %c0_i32, %c0_i32_0 : i32, i32
  }
  func.func @transform_3(%arg0: i32) -> (i32, i32) {
    %c0_i32 = arith.constant 0 : i32
    %c0_i32_0 = arith.constant 0 : i32
    return %arg0, %c0_i32 : i32, i32
  }
}

</mosaic_0001>

<bundles_post_ra>
// kernel: conv_autoencoder_forward.4
= control target key start
LH: loop header
LB: loop body
LE: loop exit
PB: predicated region body
PF: predicated region fallthrough
CT: control target
= control target key end

     0   :  { %vm110_vm0 = vcmask 1043456   ;;  %vm111_vm1 = vcmask 1044480   ;;  %vm85_vm2 = vcmask 72704   ;;  %v404_v1 = vmov 65535   ;;  %s527_s1 = inlined_call_operand.vmem [shape: bf16[9,64], index: 1, kind: input, shape index: {}]   ;;  %s528_s0 = inlined_call_operand.vmem [shape: bf16[128,9], index: 0, kind: input, shape index: {}]   ;;  %s529_s2 = inlined_call_operand.vmem [shape: f32[1,64], index: 2, kind: input, shape index: {}]   ;;  %s530_s3 = inlined_call_operand.vmem [shape: bf16[128,64], index: 3, kind: output, shape index: {}]  }
   0x1   :  { %v395_v0 = vld [vmem:[%s527_s1] sm:$0x1f]   ;;  %v112_v2 = vsel %vm110_vm0, 4294967295, %v404_v1  ;;  %v398_v7 = vld [vmem:[%s528_s0 + $0x8] sm:$0xff]   ;;  %v400_v9 = vld [vmem:[%s528_s0 + $0x10] sm:$0xff]   ;;  %vm294_vm3 = vcmask 519168  }
   0x2   :  { %v396_v3 = vld [vmem:[%s528_s0] sm:$0xff]   ;;  %v113_v4 = vsel %vm111_vm1, %v112_v2, 0  ;;  %v399_v8 = vld [vmem:[%s528_s0 + $0x28] sm:$0xff]   ;;  %v401_v10 = vld [vmem:[%s528_s0 + $0x30] sm:$0xff]  }
   0x3   :  { %v397_v5 = vld [vmem:[%s528_s0 + $0x20] sm:$0xff]   ;;  %v115_v6 = vand.u32 %v395_v0, %v113_v4  ;;  %376 = vmatprep.mubr.msk.bf16.mxu0 %vm85_vm2, %v396_v3  ;;  %v402_v11 = vld [vmem:[%s528_s0 + $0x18] sm:$0xff]  }
   0x4   :  { %384 = vmatprep.mubr.msk.bf16.mxu1 %vm85_vm2, %v397_v5  ;;  %v403_v12 = vld [vmem:[%s528_s0 + $0x38] sm:$0xff]   ;;  %v315_v13 = vld [vmem:[%s529_s2] ss:$0 sm:$0xff] }
   0x5   :  { %374 = vmatprep.subr.bf16.mxu0 %v115_v6  ;;  %392 = vmatprep.subr.bf16.mxu1 %v115_v6 }
   0x6   :  { %375 = vmatpush3.bf16.msra.mxu0 %v115_v6  ;;  %393 = vmatpush3.bf16.msra.mxu1 %v115_v6 }
   0x9   :  { %377 = vmatmul.mubr.msk.bf16.vlgmr.msra.gmra.mrb[0].mxu0 %vm85_vm2, %v398_v7  ;;  %385 = vmatmul.mubr.msk.bf16.vlgmr.msra.gmra.mrb[0].mxu1 %vm85_vm2, %v399_v8 }
   0xa   :  { %380 = vmatprep.mubr.msk.bf16.mxu0 %vm85_vm2, %v400_v9  ;;  %388 = vmatprep.mubr.msk.bf16.mxu1 %vm85_vm2, %v401_v10 }
  0x11   :  { %381 = vmatmul.mubr.msk.bf16.gmra.mrb[4].mxu0 %vm85_vm2, %v402_v11  ;;  %389 = vmatmul.mubr.msk.bf16.gmra.mrb[4].mxu1 %vm85_vm2, %v403_v12 }
  0xdc   :  { %v378_v14 = vpop.f32.mrb[0].mxu0  ;;  %v386_v15 = vpop.f32.mrb[0].mxu1 }
  0xdd   :  { %v160_v16 = vadd.f32 %v378_v14, %v315_v13  ;;  %v192_v17 = vadd.f32 %v386_v15, %v315_v13  ;;  %v151_v18 = vpop.f32.mrb[1].mxu0  ;;  %v183_v19 = vpop.f32.mrb[1].mxu1 }
  0xde   :  { %v152_v20 = vadd.f32 %v315_v13, %v151_v18  ;;  %v184_v21 = vadd.f32 %v315_v13, %v183_v19  ;;  %v379_v22 = vpop.f32.mrb[2].mxu0  ;;  %v387_v23 = vpop.f32.mrb[2].mxu1 }
  0xdf   :  { %v216_v24 = vmax.f32 %v160_v16, 0.0  ;;  %v224_v25 = vmax.f32 %v192_v17, 0.0  ;;  %v163_v26 = vadd.f32 %v379_v22, %v315_v13  ;;  %v195_v27 = vadd.f32 %v387_v23, %v315_v13  ;;  %v154_v28 = vpop.f32.mrb[3].mxu0  ;;  %v186_v29 = vpop.f32.mrb[3].mxu1 }
  0xe0   :  { %v214_v30 = vmax.f32 %v152_v20, 0.0  ;;  %v222_v31 = vmax.f32 %v184_v21, 0.0  ;;  %v155_v32 = vadd.f32 %v315_v13, %v154_v28  ;;  %v187_v33 = vadd.f32 %v315_v13, %v186_v29 }
  0xe1   :  { %v351_v34 = vpack.c.bf16 %v216_v24, %v216_v24  ;;  %v359_v35 = vpack.c.bf16 %v224_v25, %v224_v25  ;;  %v217_v36 = vmax.f32 %v163_v26, 0.0  ;;  %v225_v37 = vmax.f32 %v195_v27, 0.0 }
  0xe2   :  { %v349_v38 = vpack.c.bf16 %v214_v30, %v214_v30  ;;  %v357_v39 = vpack.c.bf16 %v222_v31, %v222_v31  ;;  %v215_v40 = vmax.f32 %v155_v32, 0.0  ;;  %v223_v41 = vmax.f32 %v187_v33, 0.0 }
  0xe3   :  { %297 = vst.msk [vmem:[%s530_s3 + $0x8] sm:$0xf] %vm294_vm3, %v351_v34  ;;  %305 = vst.msk [vmem:[%s530_s3 + $0x28] sm:$0xf] %vm294_vm3, %v359_v35  ;;  %v352_v42 = vpack.c.bf16 %v217_v36, %v217_v36  ;;  %v360_v43 = vpack.c.bf16 %v225_v37, %v225_v37 }
  0xe4   :  { %295 = vst.msk [vmem:[%s530_s3] sm:$0xf] %vm294_vm3, %v349_v38  ;;  %303 = vst.msk [vmem:[%s530_s3 + $0x20] sm:$0xf] %vm294_vm3, %v357_v39  ;;  %v350_v44 = vpack.c.bf16 %v215_v40, %v215_v40  ;;  %v358_v45 = vpack.c.bf16 %v223_v41, %v223_v41  ;;  %v382_v46 = vpop.f32.mrb[4].mxu0  ;;  %v390_v47 = vpop.f32.mrb[4].mxu1 }
  0xe5   :  { %298 = vst.msk [vmem:[%s530_s3 + $0xc] sm:$0xf] %vm294_vm3, %v352_v42  ;;  %306 = vst.msk [vmem:[%s530_s3 + $0x2c] sm:$0xf] %vm294_vm3, %v360_v43  ;;  %v176_v48 = vadd.f32 %v382_v46, %v315_v13  ;;  %v208_v49 = vadd.f32 %v390_v47, %v315_v13  ;;  %v167_v50 = vpop.f32.mrb[5].mxu0  ;;  %v199_v51 = vpop.f32.mrb[5].mxu1 }
  0xe6   :  { %296 = vst.msk [vmem:[%s530_s3 + $0x4] sm:$0xf] %vm294_vm3, %v350_v44  ;;  %304 = vst.msk [vmem:[%s530_s3 + $0x24] sm:$0xf] %vm294_vm3, %v358_v45  ;;  %v168_v52 = vadd.f32 %v315_v13, %v167_v50  ;;  %v200_v53 = vadd.f32 %v315_v13, %v199_v51  ;;  %v383_v54 = vpop.f32.mrb[6].mxu0  ;;  %v391_v55 = vpop.f32.mrb[6].mxu1 }
  0xe7   :  { %v220_v56 = vmax.f32 %v176_v48, 0.0  ;;  %v228_v57 = vmax.f32 %v208_v49, 0.0  ;;  %v179_v58 = vadd.f32 %v383_v54, %v315_v13  ;;  %v211_v59 = vadd.f32 %v391_v55, %v315_v13  ;;  %v170_v60 = vpop.f32.mrb[7].mxu0  ;;  %v202_v61 = vpop.f32.mrb[7].mxu1 }
  0xe8   :  { %v218_v62 = vmax.f32 %v168_v52, 0.0  ;;  %v226_v63 = vmax.f32 %v200_v53, 0.0  ;;  %v171_v0 = vadd.f32 %v315_v13, %v170_v60  ;;  %v203_v1 = vadd.f32 %v315_v13, %v202_v61 }
  0xe9   :  { %v355_v2 = vpack.c.bf16 %v220_v56, %v220_v56  ;;  %v363_v3 = vpack.c.bf16 %v228_v57, %v228_v57  ;;  %v221_v4 = vmax.f32 %v179_v58, 0.0  ;;  %v229_v5 = vmax.f32 %v211_v59, 0.0 }
  0xea   :  { %v353_v6 = vpack.c.bf16 %v218_v62, %v218_v62  ;;  %v361_v7 = vpack.c.bf16 %v226_v63, %v226_v63  ;;  %v219_v8 = vmax.f32 %v171_v0, 0.0  ;;  %v227_v9 = vmax.f32 %v203_v1, 0.0 }
  0xeb   :  { %301 = vst.msk [vmem:[%s530_s3 + $0x18] sm:$0xf] %vm294_vm3, %v355_v2  ;;  %309 = vst.msk [vmem:[%s530_s3 + $0x38] sm:$0xf] %vm294_vm3, %v363_v3  ;;  %v356_v10 = vpack.c.bf16 %v221_v4, %v221_v4  ;;  %v364_v11 = vpack.c.bf16 %v229_v5, %v229_v5 }
  0xec   :  { %299 = vst.msk [vmem:[%s530_s3 + $0x10] sm:$0xf] %vm294_vm3, %v353_v6  ;;  %307 = vst.msk [vmem:[%s530_s3 + $0x30] sm:$0xf] %vm294_vm3, %v361_v7  ;;  %v354_v12 = vpack.c.bf16 %v219_v8, %v219_v8  ;;  %v362_v13 = vpack.c.bf16 %v227_v9, %v227_v9 }
  0xed   :  { %302 = vst.msk [vmem:[%s530_s3 + $0x1c] sm:$0xf] %vm294_vm3, %v356_v10  ;;  %310 = vst.msk [vmem:[%s530_s3 + $0x3c] sm:$0xf] %vm294_vm3, %v364_v11 }
  0xee   :  { %300 = vst.msk [vmem:[%s530_s3 + $0x14] sm:$0xf] %vm294_vm3, %v354_v12  ;;  %308 = vst.msk [vmem:[%s530_s3 + $0x34] sm:$0xf] %vm294_vm3, %v362_v13 }

// kernel: tile.13
= control target key start
LH: loop header
LB: loop body
LE: loop exit
PB: predicated region body
PF: predicated region fallthrough
CT: control target
= control target key end

     0   :  { %s22_s0 = inlined_call_operand.vmem [shape: f32[64], index: 0, kind: input, shape index: {}]   ;;  %s23_s1 = inlined_call_operand.vmem [shape: f32[4,64], index: 1, kind: output, shape index: {}]  }
   0x1   :  { %v4_v0 = vld [vmem:[%s22_s0] ss:$0 sm:$0xff] }
   0x2   :  { %5 = vst [vmem:[%s23_s1] sm:$0xf] %v4_v0 }

// kernel: tile.14
= control target key start
LH: loop header
LB: loop body
LE: loop exit
PB: predicated region body
PF: predicated region fallthrough
CT: control target
= control target key end

     0   :  { %s6_s8 = smov 3  ;;  %vm8_vm0 = vcmask 523264   ;;  %s30_s9 = smov 64   ;;  %vm15_vm1 = vcmask 1048064   ;;  %s50_s0 = inlined_call_operand.vmem [shape: f32[4,64], index: 0, kind: input, shape index: {}]   ;;  %s51_s1 = inlined_call_operand.vmem [shape: f32[1,256], index: 1, kind: output, shape index: {}]  }
   0x1   :  { %v4_v0 = vld [vmem:[%s50_s0] sm:$0xf]  ;;  %s11_s0 = smov 3 }
   0x2   :  { %5 = vst [vmem:[#allocation1] sm:$0xf] %v4_v0 }
   0x9   :  { %v12_v1 = vld [vmem:[#allocation1 + $0x1] ss:$2 sm:%s11_s0]   ;;  %v7_v2 = vld [vmem:[#allocation1] ss:$2 sm:%s6_s8]  }
   0xa   :  { %13 = vrot.lane.b32.xlu0 %v12_v1, %s30_s9  ;;  %9 = vst.msk [vmem:[#allocation0] ss:$8 sm:$0x3] %vm8_vm0, %v7_v2  }
  0x7c   :  { %v14_v3 = vpop.permute.xlu0 %13  }
  0x7d   :  { %16 = vst.msk [vmem:[#allocation0] ss:$8 sm:$0x3] %vm15_vm1, %v14_v3  }
  0x84   :  { %v20_v4 = vld [vmem:[#allocation0] sm:$0x1]  ;;  %v24_v5 = vld [vmem:[#allocation0 + $0x8] sm:$0x1] }
  0x85   :  { %22 = vst [vmem:[%s51_s1] sm:$0x1] %v20_v4  ;;  %28 = vst [vmem:[%s51_s1 + $0x1] sm:$0x1] %v24_v5 }

// kernel: conv_autoencoder_forward.5
= control target key start
LH: loop header
LB: loop body
LE: loop exit
PB: predicated region body
PF: predicated region fallthrough
CT: control target
= control target key end

     0   :  { %vm372_vm0 = vcmask 523264   ;;  %s913_s1 = inlined_call_operand.vmem [shape: bf16[576,128], index: 1, kind: input, shape index: {}]   ;;  %s914_s0 = inlined_call_operand.vmem [shape: bf16[32,576], index: 0, kind: input, shape index: {}]   ;;  %s915_s2 = inlined_call_operand.vmem [shape: f32[1,128], index: 2, kind: input, shape index: {}]   ;;  %s916_s3 = inlined_call_operand.vmem [shape: bf16[32,128], index: 3, kind: output, shape index: {}]  }
   0x1   :  { %v696_v0 = vld [vmem:[%s913_s1 + $0x40] sm:$0xff]   ;;  %v700_v4 = vld [vmem:[%s913_s1 + $0x48] sm:$0xff]   ;;  %v704_v8 = vld [vmem:[%s913_s1 + $0x50] sm:$0xff]  }
   0x2   :  { %v697_v1 = vld [vmem:[%s913_s1] sm:$0xff]   ;;  %622 = vmatprep.subr.bf16.mxu0 %v696_v0  ;;  %v701_v5 = vld [vmem:[%s913_s1 + $0x8] sm:$0xff]   ;;  %v705_v9 = vld [vmem:[%s913_s1 + $0x10] sm:$0xff]  }
   0x3   :  { %v698_v2 = vld [vmem:[%s913_s1 + $0xc0] sm:$0xff]   ;;  %623 = vmatpush3.bf16.msra.mxu0 %v697_v1  ;;  %v702_v6 = vld [vmem:[%s913_s1 + $0xc8] sm:$0xff]   ;;  %v706_v10 = vld [vmem:[%s913_s1 + $0xd0] sm:$0xff]  }
   0x4   :  { %v699_v3 = vld [vmem:[%s913_s1 + $0x80] sm:$0xff]   ;;  %650 = vmatprep.subr.bf16.mxu1 %v698_v2  ;;  %624 = vmatprep.subr.bf16.mxu0 %v700_v4  ;;  %v703_v7 = vld [vmem:[%s913_s1 + $0x88] sm:$0xff]   ;;  %v707_v11 = vld [vmem:[%s913_s1 + $0x90] sm:$0xff]  }
   0x5   :  { %651 = vmatpush3.bf16.msra.mxu1 %v699_v3  ;;  %v708_v12 = vld [vmem:[%s913_s1 + $0x58] sm:$0xff]   ;;  %v712_v16 = vld [vmem:[%s913_s1 + $0x60] sm:$0xff]   ;;  %v716_v20 = vld [vmem:[%s913_s1 + $0x68] sm:$0xff]  }
   0x6   :  { %652 = vmatprep.subr.bf16.mxu1 %v702_v6  ;;  %v709_v13 = vld [vmem:[%s913_s1 + $0x18] sm:$0xff]   ;;  %v713_v17 = vld [vmem:[%s913_s1 + $0x20] sm:$0xff]   ;;  %v717_v21 = vld [vmem:[%s913_s1 + $0x28] sm:$0xff]  }
   0x7   :  { %625 = vmatpush3.bf16.msra.mxu0 %v701_v5  ;;  %v710_v14 = vld [vmem:[%s913_s1 + $0xd8] sm:$0xff]   ;;  %v714_v18 = vld [vmem:[%s913_s1 + $0xe0] sm:$0xff]   ;;  %v718_v22 = vld [vmem:[%s913_s1 + $0xe8] sm:$0xff]  }
   0x8   :  { %626 = vmatprep.subr.bf16.mxu0 %v704_v8  ;;  %v711_v15 = vld [vmem:[%s913_s1 + $0x98] sm:$0xff]   ;;  %v715_v19 = vld [vmem:[%s913_s1 + $0xa0] sm:$0xff]   ;;  %v719_v23 = vld [vmem:[%s913_s1 + $0xa8] sm:$0xff]  }
   0x9   :  { %653 = vmatpush3.bf16.msra.mxu1 %v703_v7  ;;  %v720_v24 = vld [vmem:[%s913_s1 + $0x70] sm:$0xff]   ;;  %v724_v28 = vld [vmem:[%s913_s1 + $0x78] sm:$0xff]   ;;  %v731_v34 = vld [vmem:[%s913_s1 + $0x100] sm:$0xff]  }
   0xa   :  { %654 = vmatprep.subr.bf16.mxu1 %v706_v10  ;;  %v721_v25 = vld [vmem:[%s913_s1 + $0x30] sm:$0xff]   ;;  %v725_v29 = vld [vmem:[%s913_s1 + $0x38] sm:$0xff]   ;;  %v734_v36 = vld [vmem:[%s914_s0 + $0xc] ss:$20 sps:$4 sm:$0xff]  }
   0xb   :  { %627 = vmatpush3.bf16.msra.mxu0 %v705_v9  ;;  %v722_v26 = vld [vmem:[%s913_s1 + $0xf0] sm:$0xff]   ;;  %v726_v30 = vld [vmem:[%s913_s1 + $0xf8] sm:$0xff]   ;;  %v735_v37 = vld [vmem:[%s913_s1 + $0x108] sm:$0xff]   ;;  %460 = vmatprep.mubr.bf16.mxu1 %v734_v36 }
   0xc   :  { %628 = vmatprep.subr.bf16.mxu0 %v708_v12  ;;  %v723_v27 = vld [vmem:[%s913_s1 + $0xb0] sm:$0xff]   ;;  %v729_v32 = vld [vmem:[%s914_s0 + $0x4] ss:$20 sps:$4 sm:$0xff]   ;;  %v732_v35 = vld [vmem:[%s914_s0 + $0x8] ss:$20 sps:$4 sm:$0xff]  }
   0xd   :  { %655 = vmatpush3.bf16.msra.mxu1 %v707_v11  ;;  %v727_v31 = vld [vmem:[%s914_s0] ss:$20 sps:$4 sm:$0xff]   ;;  %v730_v33 = vld [vmem:[%s913_s1 + $0xb8] sm:$0xff]   ;;  %411 = vmatprep.mubr.bf16.mxu0 %v729_v32  ;;  %v742_v42 = vld [vmem:[%s914_s0 + $0x30] ss:$20 sps:$4 sm:$0xff]  }
   0xe   :  { %656 = vmatprep.subr.bf16.mxu1 %v710_v14  ;;  %v736_v38 = vld [vmem:[%s914_s0 + $0x2c] ss:$20 sps:$4 sm:$0xff]   ;;  %v738_v39 = vld [vmem:[%s914_s0 + $0x28] ss:$20 sps:$4 sm:$0xff]   ;;  %v739_v40 = vld [vmem:[%s913_s1 + $0x110] sm:$0xff]  }
   0xf   :  { %629 = vmatpush3.bf16.msra.mxu0 %v709_v13  ;;  %v740_v41 = vld [vmem:[%s914_s0 + $0x34] ss:$20 sps:$4 sm:$0xff]   ;;  %v743_v43 = vld [vmem:[%s913_s1 + $0x118] sm:$0xff]   ;;  %v744_v44 = vld [vmem:[%s914_s0 + $0x10] ss:$20 sps:$4 sm:$0xff]  }
  0x10   :  { %630 = vmatprep.subr.bf16.mxu0 %v712_v16  ;;  %v745_v45 = vld [vmem:[%s914_s0 + $0x38] ss:$20 sps:$4 sm:$0xff]   ;;  %v554_v47 = vld [vmem:[%s915_s2] ss:$0 sm:$0xff] }
  0x11   :  { %657 = vmatpush3.bf16.msra.mxu1 %v711_v15 }
  0x12   :  { %658 = vmatprep.subr.bf16.mxu1 %v714_v18 }
  0x13   :  { %631 = vmatpush3.bf16.msra.mxu0 %v713_v17 }
  0x14   :  { %632 = vmatprep.subr.bf16.mxu0 %v716_v20 }
  0x15   :  { %659 = vmatpush3.bf16.msra.mxu1 %v715_v19 }
  0x16   :  { %660 = vmatprep.subr.bf16.mxu1 %v718_v22 }
  0x17   :  { %633 = vmatpush3.bf16.msra.mxu0 %v717_v21 }
  0x18   :  { %634 = vmatprep.subr.bf16.mxu0 %v720_v24 }
  0x19   :  { %661 = vmatpush3.bf16.msra.mxu1 %v719_v23 }
  0x1a   :  { %662 = vmatprep.subr.bf16.mxu1 %v722_v26 }
  0x1b   :  { %635 = vmatpush3.bf16.msra.mxu0 %v721_v25 }
  0x1c   :  { %636 = vmatprep.subr.bf16.mxu0 %v724_v28 }
  0x1d   :  { %663 = vmatpush3.bf16.msra.mxu1 %v723_v27 }
  0x1e   :  { %664 = vmatprep.subr.bf16.mxu1 %v726_v30 }
  0x1f   :  { %637 = vmatpush3.bf16.msra.mxu0 %v725_v29 }
  0x20   :  { %684 = vmatprep.subr.bf16.mxu0 %v731_v34 }
  0x21   :  { %665 = vmatpush3.bf16.msra.mxu1 %v730_v33 }
  0x22   :  { %412 = vmatmul.mubr.bf16.vlgmr.msra.gmra.mrb[0].mxu0 %v727_v31 }
  0x23   :  { %685 = vmatpush3.bf16.msra.mxu0 %v731_v34  ;;  %419 = vmatprep.mubr.bf16.mxu0 %v736_v38 }
  0x24   :  { %461 = vmatmul.mubr.bf16.vlgmr.msra.gmra.mrb[0].mxu1 %v732_v35  ;;  %686 = vmatprep.subr.bf16.mxu0 %v735_v37 }
  0x25   :  { %468 = vmatprep.mubr.bf16.mxu1 %v740_v41 }
  0x27   :  { %687 = vmatpush3.bf16.msra.mxu0 %v735_v37 }
  0x28   :  { %688 = vmatprep.subr.bf16.mxu0 %v739_v40 }
  0x2a   :  { %420 = vmatmul.mubr.bf16.gmra.mrb[4].mxu0 %v738_v39 }
  0x2b   :  { %692 = vmatprep.mubr.msk.bf16.mxu0 %vm372_vm0, %v744_v44  ;;  %689 = vmatpush3.bf16.msra.mxu0 %v739_v40 }
  0x2c   :  { %469 = vmatmul.mubr.bf16.gmra.mrb[4].mxu1 %v742_v42  ;;  %690 = vmatprep.subr.bf16.mxu0 %v743_v43 }
  0x2f   :  { %691 = vmatpush3.bf16.msra.mxu0 %v743_v43 }
  0x32   :  { %693 = vmatmul.mubr.msk.bf16.vlgmr.msra.gmra.mrb[8].mxu0 %vm372_vm0, %v745_v45 }
  0xf5   :  { %v638_v46 = vpop.f32.mrb[0].mxu0 }
  0xf6   :  { %v639_v48 = vpop.f32.mrb[1].mxu0 }
  0xf7   :  { %v640_v49 = vadd.f32 %v639_v48, %v638_v46  ;;  %v641_v50 = vpop.f32.mrb[2].mxu0  ;;  %v666_v51 = vpop.f32.mrb[0].mxu1 }
  0xf8   :  { %v642_v52 = vpop.f32.mrb[3].mxu0  ;;  %v667_v55 = vpop.f32.mrb[1].mxu1 }
  0xf9   :  { %v414_v53 = vadd.f32 %v640_v49, %v554_v47  ;;  %v643_v54 = vadd.f32 %v642_v52, %v641_v50  ;;  %v668_v56 = vadd.f32 %v667_v55, %v666_v51  ;;  %v669_v57 = vpop.f32.mrb[2].mxu1 }
  0xfa   :  { %v670_v59 = vpop.f32.mrb[3].mxu1 }
  0xfb   :  { %v417_v58 = vadd.f32 %v643_v54, %v554_v47  ;;  %v671_v60 = vadd.f32 %v670_v59, %v669_v57  ;;  %v463_v61 = vadd.f32 %v668_v56, %v414_v53 }
  0xfd   :  { %v644_v62 = vpop.f32.mrb[4].mxu0  ;;  %v466_v0 = vadd.f32 %v671_v60, %v417_v58 }
  0xfe   :  { %v645_v63 = vpop.f32.mrb[5].mxu0 }
  0xff   :  { %v646_v1 = vadd.f32 %v645_v63, %v644_v62  ;;  %v647_v2 = vpop.f32.mrb[6].mxu0  ;;  %v672_v3 = vpop.f32.mrb[4].mxu1 }
 0x100   :  { %v648_v4 = vpop.f32.mrb[7].mxu0  ;;  %v673_v7 = vpop.f32.mrb[5].mxu1 }
 0x101   :  { %v422_v5 = vadd.f32 %v646_v1, %v554_v47  ;;  %v649_v6 = vadd.f32 %v648_v4, %v647_v2  ;;  %v674_v8 = vadd.f32 %v673_v7, %v672_v3  ;;  %v675_v9 = vpop.f32.mrb[6].mxu1 }
 0x102   :  { %v676_v11 = vpop.f32.mrb[7].mxu1 }
 0x103   :  { %v425_v10 = vadd.f32 %v649_v6, %v554_v47  ;;  %v677_v12 = vadd.f32 %v676_v11, %v675_v9  ;;  %v471_v13 = vadd.f32 %v674_v8, %v422_v5 }
 0x105   :  { %v694_v14 = vpop.f32.mrb[8].mxu0  ;;  %v474_v15 = vadd.f32 %v677_v12, %v425_v10 }
 0x106   :  { %v520_v16 = vadd.f32 %v694_v14, %v471_v13  ;;  %v511_v17 = vpop.f32.mrb[9].mxu0 }
 0x107   :  { %v512_v18 = vadd.f32 %v511_v17, %v463_v61  ;;  %v695_v19 = vpop.f32.mrb[10].mxu0 }
 0x108   :  { %v523_v20 = vadd.f32 %v695_v19, %v474_v15  ;;  %v514_v21 = vpop.f32.mrb[11].mxu0  ;;  %v528_v23 = vmax.f32 %v520_v16, 0.0 }
 0x109   :  { %v515_v22 = vadd.f32 %v514_v21, %v466_v0  ;;  %v526_v25 = vmax.f32 %v512_v18, 0.0 }
 0x10a   :  { %v529_v24 = vmax.f32 %v523_v20, 0.0 }
 0x10b   :  { %v527_v26 = vmax.f32 %v515_v22, 0.0 }
 0x10c   :  { %v619_v27 = vpack.c.bf16 %v529_v24, %v528_v23 }
 0x10d   :  { %v614_v28 = vpack.c.bf16 %v527_v26, %v526_v25 }
 0x10e   :  { %621 = vst [vmem:[%s916_s3 + $0x8] sm:$0xff] %v619_v27  }
 0x10f   :  { %615 = vst [vmem:[%s916_s3] sm:$0xff] %v614_v28  }

// kernel: conv_autoencoder_forward.6
= control target key start
LH: loop header
LB: loop body
LE: loop exit
PB: predicated region body
PF: predicated region fallthrough
CT: control target
= control target key end

     0   :  { %s1059_s1 = inlined_call_operand.vmem [shape: bf16[512,256], index: 1, kind: input, shape index: {}]   ;;  %s1060_s0 = inlined_call_operand.vmem [shape: bf16[32,512], index: 0, kind: input, shape index: {}]   ;;  %s1061_s2 = inlined_call_operand.vmem [shape: f32[1,256], index: 2, kind: input, shape index: {}]   ;;  %s1062_s3 = inlined_call_operand.vmem [shape: bf16[32,256], index: 3, kind: output, shape index: {}]  }
   0x1   :  { %v700_v0 = vld [vmem:[%s1059_s1 + $0x4] ss:$8 sps:$4 sm:$0xff]   ;;  %v704_v2 = vld [vmem:[%s1059_s1] ss:$8 sps:$4 sm:$0xff]   ;;  %v706_v4 = vld [vmem:[%s1059_s1 + $0x14] ss:$8 sps:$4 sm:$0xff]  }
   0x2   :  { %v702_v1 = vld [vmem:[%s1059_s1 + $0x104] ss:$8 sps:$4 sm:$0xff]   ;;  %458 = vmatprep.subr.bf16.mxu1 %v700_v0  ;;  %v705_v3 = vld [vmem:[%s1059_s1 + $0x100] ss:$8 sps:$4 sm:$0xff]   ;;  %v708_v5 = vld [vmem:[%s1059_s1 + $0x114] ss:$8 sps:$4 sm:$0xff]  }
   0x3   :  { %511 = vmatprep.subr.bf16.mxu0 %v702_v1  ;;  %459 = vmatpush1.bf16.msra.mxu1 %v704_v2  ;;  %v710_v6 = vld [vmem:[%s1059_s1 + $0x10] ss:$8 sps:$4 sm:$0xff]   ;;  %v712_v8 = vld [vmem:[%s1059_s1 + $0x24] ss:$8 sps:$4 sm:$0xff]   ;;  %v716_v10 = vld [vmem:[%s1059_s1 + $0x20] ss:$8 sps:$4 sm:$0xff]  }
   0x4   :  { %512 = vmatpush1.bf16.msra.mxu0 %v705_v3  ;;  %460 = vmatprep.subr.bf16.mxu1 %v706_v4  ;;  %v711_v7 = vld [vmem:[%s1059_s1 + $0x110] ss:$8 sps:$4 sm:$0xff]   ;;  %v714_v9 = vld [vmem:[%s1059_s1 + $0x124] ss:$8 sps:$4 sm:$0xff]   ;;  %v717_v11 = vld [vmem:[%s1059_s1 + $0x120] ss:$8 sps:$4 sm:$0xff]  }
   0x5   :  { %513 = vmatprep.subr.bf16.mxu0 %v708_v5  ;;  %v718_v12 = vld [vmem:[%s1059_s1 + $0x34] ss:$8 sps:$4 sm:$0xff]   ;;  %v722_v14 = vld [vmem:[%s1059_s1 + $0x30] ss:$8 sps:$4 sm:$0xff]   ;;  %v724_v16 = vld [vmem:[%s1059_s1 + $0x44] ss:$8 sps:$4 sm:$0xff]  }
   0x6   :  { %v720_v13 = vld [vmem:[%s1059_s1 + $0x134] ss:$8 sps:$4 sm:$0xff]   ;;  %v723_v15 = vld [vmem:[%s1059_s1 + $0x130] ss:$8 sps:$4 sm:$0xff]   ;;  %v726_v17 = vld [vmem:[%s1059_s1 + $0x144] ss:$8 sps:$4 sm:$0xff]  }
   0x7   :  { %461 = vmatpush1.bf16.msra.mxu1 %v710_v6  ;;  %v728_v18 = vld [vmem:[%s1059_s1 + $0x40] ss:$8 sps:$4 sm:$0xff]   ;;  %v730_v20 = vld [vmem:[%s1059_s1 + $0x54] ss:$8 sps:$4 sm:$0xff]   ;;  %v734_v22 = vld [vmem:[%s1059_s1 + $0x50] ss:$8 sps:$4 sm:$0xff]  }
   0x8   :  { %514 = vmatpush1.bf16.msra.mxu0 %v711_v7  ;;  %462 = vmatprep.subr.bf16.mxu1 %v712_v8  ;;  %v729_v19 = vld [vmem:[%s1059_s1 + $0x140] ss:$8 sps:$4 sm:$0xff]   ;;  %v732_v21 = vld [vmem:[%s1059_s1 + $0x154] ss:$8 sps:$4 sm:$0xff]   ;;  %v735_v23 = vld [vmem:[%s1059_s1 + $0x150] ss:$8 sps:$4 sm:$0xff]   ;;  %v88_v8 = vlaneseq }
   0x9   :  { %515 = vmatprep.subr.bf16.mxu0 %v714_v9  ;;  %v736_v24 = vld [vmem:[%s1059_s1 + $0x64] ss:$8 sps:$4 sm:$0xff]   ;;  %v740_v26 = vld [vmem:[%s1059_s1 + $0x60] ss:$8 sps:$4 sm:$0xff]   ;;  %v742_v28 = vld [vmem:[%s1059_s1 + $0x74] ss:$8 sps:$4 sm:$0xff]  }
   0xa   :  { %v738_v25 = vld [vmem:[%s1059_s1 + $0x164] ss:$8 sps:$4 sm:$0xff]   ;;  %v741_v27 = vld [vmem:[%s1059_s1 + $0x160] ss:$8 sps:$4 sm:$0xff]   ;;  %v744_v29 = vld [vmem:[%s1059_s1 + $0x174] ss:$8 sps:$4 sm:$0xff]  }
   0xb   :  { %463 = vmatpush1.bf16.msra.mxu1 %v716_v10  ;;  %v746_v30 = vld [vmem:[%s1059_s1 + $0x70] ss:$8 sps:$4 sm:$0xff]   ;;  %v748_v32 = vld [vmem:[%s1059_s1 + $0x84] ss:$8 sps:$4 sm:$0xff]   ;;  %v752_v34 = vld [vmem:[%s1059_s1 + $0x80] ss:$8 sps:$4 sm:$0xff]  }
   0xc   :  { %516 = vmatpush1.bf16.msra.mxu0 %v717_v11  ;;  %464 = vmatprep.subr.bf16.mxu1 %v718_v12  ;;  %v747_v31 = vld [vmem:[%s1059_s1 + $0x170] ss:$8 sps:$4 sm:$0xff]   ;;  %v750_v33 = vld [vmem:[%s1059_s1 + $0x184] ss:$8 sps:$4 sm:$0xff]   ;;  %v753_v35 = vld [vmem:[%s1059_s1 + $0x180] ss:$8 sps:$4 sm:$0xff]  }
   0xd   :  { %517 = vmatprep.subr.bf16.mxu0 %v720_v13  ;;  %v754_v36 = vld [vmem:[%s1059_s1 + $0x94] ss:$8 sps:$4 sm:$0xff]   ;;  %v758_v38 = vld [vmem:[%s1059_s1 + $0x90] ss:$8 sps:$4 sm:$0xff]   ;;  %v760_v40 = vld [vmem:[%s1059_s1 + $0xa4] ss:$8 sps:$4 sm:$0xff]  }
   0xe   :  { %v756_v37 = vld [vmem:[%s1059_s1 + $0x194] ss:$8 sps:$4 sm:$0xff]   ;;  %v759_v39 = vld [vmem:[%s1059_s1 + $0x190] ss:$8 sps:$4 sm:$0xff]   ;;  %v762_v41 = vld [vmem:[%s1059_s1 + $0x1a4] ss:$8 sps:$4 sm:$0xff]  }
   0xf   :  { %465 = vmatpush1.bf16.msra.mxu1 %v722_v14  ;;  %v764_v42 = vld [vmem:[%s1059_s1 + $0xa0] ss:$8 sps:$4 sm:$0xff]   ;;  %v766_v44 = vld [vmem:[%s1059_s1 + $0xb4] ss:$8 sps:$4 sm:$0xff]   ;;  %v770_v46 = vld [vmem:[%s1059_s1 + $0xb0] ss:$8 sps:$4 sm:$0xff]  }
  0x10   :  { %518 = vmatpush1.bf16.msra.mxu0 %v723_v15  ;;  %466 = vmatprep.subr.bf16.mxu1 %v724_v16  ;;  %v765_v43 = vld [vmem:[%s1059_s1 + $0x1a0] ss:$8 sps:$4 sm:$0xff]   ;;  %v768_v45 = vld [vmem:[%s1059_s1 + $0x1b4] ss:$8 sps:$4 sm:$0xff]   ;;  %v771_v47 = vld [vmem:[%s1059_s1 + $0x1b0] ss:$8 sps:$4 sm:$0xff]  }
  0x11   :  { %519 = vmatprep.subr.bf16.mxu0 %v726_v17  ;;  %v772_v48 = vld [vmem:[%s1059_s1 + $0xc4] ss:$8 sps:$4 sm:$0xff]   ;;  %v776_v52 = vld [vmem:[%s1059_s1 + $0xc0] ss:$8 sps:$4 sm:$0xff]   ;;  %v778_v54 = vld [vmem:[%s1059_s1 + $0xd4] ss:$8 sps:$4 sm:$0xff]  }
  0x12   :  { %v798_v49 = vld [vmem:[%s1060_s0 + $0x4] ss:$16 sps:$4 sm:$0xff]   ;;  %v801_v51 = vld [vmem:[%s1060_s0 + $0xc] ss:$16 sps:$4 sm:$0xff]   ;;  %v777_v53 = vld [vmem:[%s1059_s1 + $0x1c0] ss:$8 sps:$4 sm:$0xff]  }
  0x13   :  { %467 = vmatpush1.bf16.msra.mxu1 %v728_v18  ;;  %v774_v50 = vld [vmem:[%s1059_s1 + $0x1c4] ss:$8 sps:$4 sm:$0xff]   ;;  %490 = vmatprep.mubr.bf16.mxu1 %v798_v49  ;;  %v780_v55 = vld [vmem:[%s1059_s1 + $0x1d4] ss:$8 sps:$4 sm:$0xff]   ;;  %v782_v56 = vld [vmem:[%s1059_s1 + $0xd0] ss:$8 sps:$4 sm:$0xff]  }
  0x14   :  { %520 = vmatpush1.bf16.msra.mxu0 %v729_v19  ;;  %468 = vmatprep.subr.bf16.mxu1 %v730_v20  ;;  %v783_v57 = vld [vmem:[%s1059_s1 + $0x1d0] ss:$8 sps:$4 sm:$0xff]   ;;  %v784_v58 = vld [vmem:[%s1059_s1 + $0xe4] ss:$8 sps:$4 sm:$0xff]   ;;  %v788_v60 = vld [vmem:[%s1059_s1 + $0xe0] ss:$8 sps:$4 sm:$0xff]  }
  0x15   :  { %521 = vmatprep.subr.bf16.mxu0 %v732_v21  ;;  %543 = vmatprep.mubr.bf16.mxu0 %v801_v51  ;;  %v786_v59 = vld [vmem:[%s1059_s1 + $0x1e4] ss:$8 sps:$4 sm:$0xff]   ;;  %v789_v61 = vld [vmem:[%s1059_s1 + $0x1e0] ss:$8 sps:$4 sm:$0xff]   ;;  %v790_v62 = vld [vmem:[%s1059_s1 + $0xf4] ss:$8 sps:$4 sm:$0xff]  }
  0x16   :  { %v792_v63 = vld [vmem:[%s1059_s1 + $0x1f4] ss:$8 sps:$4 sm:$0xff]   ;;  %v794_v0 = vld [vmem:[%s1059_s1 + $0xf0] ss:$8 sps:$4 sm:$0xff]   ;;  %v89_v9 = vshrl.u32 %v88_v8, 7 }
  0x17   :  { %469 = vmatpush1.bf16.msra.mxu1 %v734_v22  ;;  %v795_v1 = vld [vmem:[%s1059_s1 + $0x1f0] ss:$8 sps:$4 sm:$0xff]   ;;  %v802_v4 = vld [vmem:[%s1060_s0 + $0x24] ss:$16 sps:$4 sm:$0xff]   ;;  %v804_v5 = vld [vmem:[%s1060_s0 + $0x2c] ss:$16 sps:$4 sm:$0xff]  }
  0x18   :  { %522 = vmatpush1.bf16.msra.mxu0 %v735_v23  ;;  %470 = vmatprep.subr.bf16.mxu1 %v736_v24  ;;  %v796_v2 = vld [vmem:[%s1060_s0] ss:$16 sps:$4 sm:$0xff]   ;;  %v799_v3 = vld [vmem:[%s1060_s0 + $0x8] ss:$16 sps:$4 sm:$0xff]   ;;  %v90_v10 = vsub.s32 0, %v89_v9  ;;  %v94_v12 = vsub.s32 1, %v89_v9 }
  0x19   :  { %523 = vmatprep.subr.bf16.mxu0 %v738_v25  ;;  %v806_v6 = vld [vmem:[%s1060_s0 + $0x20] ss:$16 sps:$4 sm:$0xff]   ;;  %v807_v7 = vld [vmem:[%s1060_s0 + $0x28] ss:$16 sps:$4 sm:$0xff]  }
  0x1a   :  { %v86_v11 = vld [vmem:[%s1061_s2] sm:$0x3] }
  0x1b   :  { %471 = vmatpush1.bf16.msra.mxu1 %v740_v26  ;;  %v91_v13 = vrot.slane %v86_v11, %v90_v10  ;;  %v95_v14 = vrot.slane %v86_v11, %v94_v12 }
  0x1c   :  { %524 = vmatpush1.bf16.msra.mxu0 %v741_v27  ;;  %472 = vmatprep.subr.bf16.mxu1 %v742_v28 }
  0x1d   :  { %525 = vmatprep.subr.bf16.mxu0 %v744_v29 }
  0x1f   :  { %473 = vmatpush1.bf16.msra.mxu1 %v746_v30 }
  0x20   :  { %526 = vmatpush1.bf16.msra.mxu0 %v747_v31  ;;  %474 = vmatprep.subr.bf16.mxu1 %v748_v32 }
  0x21   :  { %527 = vmatprep.subr.bf16.mxu0 %v750_v33 }
  0x23   :  { %475 = vmatpush1.bf16.msra.mxu1 %v752_v34 }
  0x24   :  { %528 = vmatpush1.bf16.msra.mxu0 %v753_v35  ;;  %476 = vmatprep.subr.bf16.mxu1 %v754_v36 }
  0x25   :  { %529 = vmatprep.subr.bf16.mxu0 %v756_v37 }
  0x27   :  { %477 = vmatpush1.bf16.msra.mxu1 %v758_v38 }
  0x28   :  { %530 = vmatpush1.bf16.msra.mxu0 %v759_v39  ;;  %478 = vmatprep.subr.bf16.mxu1 %v760_v40 }
  0x29   :  { %531 = vmatprep.subr.bf16.mxu0 %v762_v41 }
  0x2b   :  { %479 = vmatpush1.bf16.msra.mxu1 %v764_v42 }
  0x2c   :  { %532 = vmatpush1.bf16.msra.mxu0 %v765_v43  ;;  %480 = vmatprep.subr.bf16.mxu1 %v766_v44 }
  0x2d   :  { %533 = vmatprep.subr.bf16.mxu0 %v768_v45 }
  0x2f   :  { %481 = vmatpush1.bf16.msra.mxu1 %v770_v46 }
  0x30   :  { %534 = vmatpush1.bf16.msra.mxu0 %v771_v47  ;;  %482 = vmatprep.subr.bf16.mxu1 %v772_v48 }
  0x31   :  { %535 = vmatprep.subr.bf16.mxu0 %v774_v50 }
  0x33   :  { %483 = vmatpush1.bf16.msra.mxu1 %v776_v52 }
  0x34   :  { %536 = vmatpush1.bf16.msra.mxu0 %v777_v53  ;;  %484 = vmatprep.subr.bf16.mxu1 %v778_v54 }
  0x35   :  { %537 = vmatprep.subr.bf16.mxu0 %v780_v55 }
  0x37   :  { %485 = vmatpush1.bf16.msra.mxu1 %v782_v56 }
  0x38   :  { %538 = vmatpush1.bf16.msra.mxu0 %v783_v57  ;;  %486 = vmatprep.subr.bf16.mxu1 %v784_v58 }
  0x39   :  { %539 = vmatprep.subr.bf16.mxu0 %v786_v59 }
  0x3b   :  { %487 = vmatpush1.bf16.msra.mxu1 %v788_v60 }
  0x3c   :  { %540 = vmatpush1.bf16.msra.mxu0 %v789_v61  ;;  %488 = vmatprep.subr.bf16.mxu1 %v790_v62 }
  0x3d   :  { %541 = vmatprep.subr.bf16.mxu0 %v792_v63 }
  0x3f   :  { %489 = vmatpush1.bf16.msra.mxu1 %v794_v0 }
  0x40   :  { %542 = vmatpush1.bf16.msra.mxu0 %v795_v1 }
  0x42   :  { %491 = vmatmul.mubr.bf16.vlgmr.msra.gmra.mrb[0].mxu1 %v796_v2 }
  0x43   :  { %544 = vmatmul.mubr.bf16.vlgmr.msra.gmra.mrb[0].mxu0 %v799_v3  ;;  %500 = vmatprep.mubr.bf16.mxu1 %v802_v4 }
  0x44   :  { %553 = vmatprep.mubr.bf16.mxu0 %v804_v5 }
  0x4a   :  { %501 = vmatmul.mubr.bf16.gmra.mrb[4].mxu1 %v806_v6 }
  0x4b   :  { %554 = vmatmul.mubr.bf16.gmra.mrb[4].mxu0 %v807_v7 }
 0x115   :  { %v492_v15 = vpop.f32.mrb[0].mxu1 }
 0x116   :  { %v545_v16 = vpop.f32.mrb[0].mxu0  ;;  %v493_v17 = vadd.f32 %v492_v15, %v91_v13  ;;  %v494_v18 = vpop.f32.mrb[1].mxu1 }
 0x117   :  { %v547_v19 = vpop.f32.mrb[1].mxu0  ;;  %v495_v20 = vadd.f32 %v494_v18, %v95_v14  ;;  %v496_v21 = vpop.f32.mrb[2].mxu1 }
 0x118   :  { %v549_v22 = vpop.f32.mrb[2].mxu0  ;;  %v546_v23 = vadd.f32 %v545_v16, %v493_v17  ;;  %v497_v24 = vadd.f32 %v496_v21, %v91_v13  ;;  %v498_v25 = vpop.f32.mrb[3].mxu1 }
 0x119   :  { %v551_v26 = vpop.f32.mrb[3].mxu0  ;;  %v548_v27 = vadd.f32 %v547_v19, %v495_v20  ;;  %v499_v28 = vadd.f32 %v498_v25, %v95_v14 }
 0x11a   :  { %v564_v29 = vmax.f32 %v546_v23, 0.0  ;;  %v550_v30 = vadd.f32 %v549_v22, %v497_v24 }
 0x11b   :  { %v565_v31 = vmax.f32 %v548_v27, 0.0  ;;  %v552_v32 = vadd.f32 %v551_v26, %v499_v28 }
 0x11c   :  { %v566_v33 = vmax.f32 %v550_v30, 0.0 }
 0x11d   :  { %v680_v34 = vpack.c.bf16 %v565_v31, %v564_v29  ;;  %v567_v35 = vmax.f32 %v552_v32, 0.0  ;;  %v502_v36 = vpop.f32.mrb[4].mxu1 }
 0x11e   :  { %v555_v37 = vpop.f32.mrb[4].mxu0  ;;  %v503_v38 = vadd.f32 %v502_v36, %v91_v13  ;;  %v504_v39 = vpop.f32.mrb[5].mxu1 }
 0x11f   :  { %v557_v40 = vpop.f32.mrb[5].mxu0  ;;  %596 = vst [vmem:[%s1062_s3] sm:$0xff] %v680_v34  ;;  %v681_v41 = vpack.c.bf16 %v567_v35, %v566_v33  ;;  %v505_v42 = vadd.f32 %v504_v39, %v95_v14  ;;  %v506_v43 = vpop.f32.mrb[6].mxu1 }
 0x120   :  { %v559_v44 = vpop.f32.mrb[6].mxu0  ;;  %v556_v45 = vadd.f32 %v555_v37, %v503_v38  ;;  %v507_v46 = vadd.f32 %v506_v43, %v91_v13  ;;  %v508_v47 = vpop.f32.mrb[7].mxu1 }
 0x121   :  { %v561_v48 = vpop.f32.mrb[7].mxu0  ;;  %597 = vst [vmem:[%s1062_s3 + $0x8] sm:$0xff] %v681_v41  ;;  %v558_v49 = vadd.f32 %v557_v40, %v505_v42  ;;  %v509_v50 = vadd.f32 %v508_v47, %v95_v14 }
 0x122   :  { %v568_v51 = vmax.f32 %v556_v45, 0.0  ;;  %v560_v52 = vadd.f32 %v559_v44, %v507_v46 }
 0x123   :  { %v569_v53 = vmax.f32 %v558_v49, 0.0  ;;  %v562_v54 = vadd.f32 %v561_v48, %v509_v50 }
 0x124   :  { %v570_v55 = vmax.f32 %v560_v52, 0.0 }
 0x125   :  { %v682_v56 = vpack.c.bf16 %v569_v53, %v568_v51  ;;  %v571_v57 = vmax.f32 %v562_v54, 0.0 }
 0x127   :  { %598 = vst [vmem:[%s1062_s3 + $0x10] sm:$0xff] %v682_v56  ;;  %v683_v58 = vpack.c.bf16 %v571_v57, %v570_v55 }
 0x129   :  { %599 = vst [vmem:[%s1062_s3 + $0x18] sm:$0xff] %v683_v58 }

// kernel: conv_autoencoder_forward.7
= control target key start
LH: loop header
LB: loop body
LE: loop exit
PB: predicated region body
PF: predicated region fallthrough
CT: control target
= control target key end

     0   :  { %s861_s1 = inlined_call_operand.vmem [shape: bf16[256,128], index: 1, kind: input, shape index: {}]   ;;  %s862_s0 = inlined_call_operand.vmem [shape: bf16[128,256], index: 0, kind: input, shape index: {}]   ;;  %s863_s2 = inlined_call_operand.vmem [shape: f32[1,128], index: 2, kind: input, shape index: {}]   ;;  %s864_s3 = inlined_call_operand.vmem [shape: f32[128,128], index: 3, kind: output, shape index: {}]  }
   0x1   :  { %v572_v0 = vld [vmem:[%s861_s1 + $0x40] sm:$0xff]   ;;  %v574_v2 = vld [vmem:[%s861_s1 + $0x48] sm:$0xff]   ;;  %v576_v4 = vld [vmem:[%s861_s1 + $0x50] sm:$0xff]  }
   0x2   :  { %v573_v1 = vld [vmem:[%s861_s1] sm:$0xff]   ;;  %492 = vmatprep.subr.bf16.mxu0 %v572_v0  ;;  %556 = vmatprep.subr.bf16.mxu1 %v572_v0  ;;  %v575_v3 = vld [vmem:[%s861_s1 + $0x8] sm:$0xff]   ;;  %v577_v5 = vld [vmem:[%s861_s1 + $0x10] sm:$0xff]  }
   0x3   :  { %493 = vmatpush3.bf16.msra.mxu0 %v573_v1  ;;  %564 = vmatpush3.bf16.msra.mxu1 %v573_v1  ;;  %v578_v6 = vld [vmem:[%s861_s1 + $0x58] sm:$0xff]   ;;  %v580_v8 = vld [vmem:[%s861_s1 + $0x60] sm:$0xff]   ;;  %v582_v10 = vld [vmem:[%s861_s1 + $0x68] sm:$0xff]  }
   0x4   :  { %494 = vmatprep.subr.bf16.mxu0 %v574_v2  ;;  %557 = vmatprep.subr.bf16.mxu1 %v574_v2  ;;  %v579_v7 = vld [vmem:[%s861_s1 + $0x18] sm:$0xff]   ;;  %v581_v9 = vld [vmem:[%s861_s1 + $0x20] sm:$0xff]   ;;  %v583_v13 = vld [vmem:[%s861_s1 + $0x28] sm:$0xff]  }
   0x5   :  { %v590_v11 = vld [vmem:[%s862_s0 + $0x4] ss:$8 sps:$4 sm:$0xff]   ;;  %v584_v14 = vld [vmem:[%s861_s1 + $0x70] sm:$0xff]   ;;  %v586_v16 = vld [vmem:[%s861_s1 + $0x78] sm:$0xff]  }
   0x6   :  { %v593_v12 = vld [vmem:[%s862_s0 + $0x44] ss:$8 sps:$4 sm:$0xff]   ;;  %278 = vmatprep.mubr.bf16.mxu0 %v590_v11  ;;  %v585_v15 = vld [vmem:[%s861_s1 + $0x30] sm:$0xff]   ;;  %v587_v17 = vld [vmem:[%s861_s1 + $0x38] sm:$0xff]  }
   0x7   :  { %495 = vmatpush3.bf16.msra.mxu0 %v575_v3  ;;  %565 = vmatpush3.bf16.msra.mxu1 %v575_v3  ;;  %v588_v18 = vld [vmem:[%s862_s0] ss:$8 sps:$4 sm:$0xff]   ;;  %v594_v20 = vld [vmem:[%s862_s0 + $0x14] ss:$8 sps:$4 sm:$0xff]   ;;  %v598_v22 = vld [vmem:[%s862_s0 + $0x10] ss:$8 sps:$4 sm:$0xff]  }
   0x8   :  { %496 = vmatprep.subr.bf16.mxu0 %v576_v4  ;;  %558 = vmatprep.subr.bf16.mxu1 %v576_v4  ;;  %v591_v19 = vld [vmem:[%s862_s0 + $0x40] ss:$8 sps:$4 sm:$0xff]   ;;  %v596_v21 = vld [vmem:[%s862_s0 + $0x54] ss:$8 sps:$4 sm:$0xff]   ;;  %v599_v23 = vld [vmem:[%s862_s0 + $0x50] ss:$8 sps:$4 sm:$0xff]  }
   0x9   :  { %310 = vmatprep.mubr.bf16.mxu1 %v593_v12  ;;  %v600_v24 = vld [vmem:[%s862_s0 + $0x24] ss:$8 sps:$4 sm:$0xff]   ;;  %v604_v26 = vld [vmem:[%s862_s0 + $0x20] ss:$8 sps:$4 sm:$0xff]   ;;  %v606_v28 = vld [vmem:[%s862_s0 + $0x34] ss:$8 sps:$4 sm:$0xff]  }
   0xa   :  { %v602_v25 = vld [vmem:[%s862_s0 + $0x64] ss:$8 sps:$4 sm:$0xff]   ;;  %v605_v27 = vld [vmem:[%s862_s0 + $0x60] ss:$8 sps:$4 sm:$0xff]   ;;  %v608_v29 = vld [vmem:[%s862_s0 + $0x74] ss:$8 sps:$4 sm:$0xff]  }
   0xb   :  { %497 = vmatpush3.bf16.msra.mxu0 %v577_v5  ;;  %566 = vmatpush3.bf16.msra.mxu1 %v577_v5  ;;  %v610_v30 = vld [vmem:[%s862_s0 + $0x30] ss:$8 sps:$4 sm:$0xff]   ;;  %v795_v34 = vld [vmem:[%s863_s2] ss:$0 sm:$0xff] }
   0xc   :  { %498 = vmatprep.subr.bf16.mxu0 %v578_v6  ;;  %559 = vmatprep.subr.bf16.mxu1 %v578_v6  ;;  %v611_v31 = vld [vmem:[%s862_s0 + $0x70] ss:$8 sps:$4 sm:$0xff]  }
   0xf   :  { %499 = vmatpush3.bf16.msra.mxu0 %v579_v7  ;;  %567 = vmatpush3.bf16.msra.mxu1 %v579_v7 }
  0x10   :  { %500 = vmatprep.subr.bf16.mxu0 %v580_v8  ;;  %560 = vmatprep.subr.bf16.mxu1 %v580_v8 }
  0x13   :  { %501 = vmatpush3.bf16.msra.mxu0 %v581_v9  ;;  %568 = vmatpush3.bf16.msra.mxu1 %v581_v9 }
  0x14   :  { %502 = vmatprep.subr.bf16.mxu0 %v582_v10  ;;  %561 = vmatprep.subr.bf16.mxu1 %v582_v10 }
  0x17   :  { %503 = vmatpush3.bf16.msra.mxu0 %v583_v13  ;;  %569 = vmatpush3.bf16.msra.mxu1 %v583_v13 }
  0x18   :  { %504 = vmatprep.subr.bf16.mxu0 %v584_v14  ;;  %562 = vmatprep.subr.bf16.mxu1 %v584_v14 }
  0x1b   :  { %505 = vmatpush3.bf16.msra.mxu0 %v585_v15  ;;  %570 = vmatpush3.bf16.msra.mxu1 %v585_v15 }
  0x1c   :  { %506 = vmatprep.subr.bf16.mxu0 %v586_v16  ;;  %563 = vmatprep.subr.bf16.mxu1 %v586_v16 }
  0x1f   :  { %507 = vmatpush3.bf16.msra.mxu0 %v587_v17  ;;  %571 = vmatpush3.bf16.msra.mxu1 %v587_v17 }
  0x22   :  { %279 = vmatmul.mubr.bf16.vlgmr.msra.gmra.mrb[0].mxu0 %v588_v18  ;;  %311 = vmatmul.mubr.bf16.vlgmr.msra.gmra.mrb[0].mxu1 %v591_v19 }
  0x23   :  { %286 = vmatprep.mubr.bf16.mxu0 %v594_v20  ;;  %318 = vmatprep.mubr.bf16.mxu1 %v596_v21 }
  0x2a   :  { %287 = vmatmul.mubr.bf16.gmra.mrb[4].mxu0 %v598_v22  ;;  %319 = vmatmul.mubr.bf16.gmra.mrb[4].mxu1 %v599_v23 }
  0x2b   :  { %294 = vmatprep.mubr.bf16.mxu0 %v600_v24  ;;  %326 = vmatprep.mubr.bf16.mxu1 %v602_v25 }
  0x32   :  { %295 = vmatmul.mubr.bf16.gmra.mrb[8].mxu0 %v604_v26  ;;  %327 = vmatmul.mubr.bf16.gmra.mrb[8].mxu1 %v605_v27 }
  0x33   :  { %302 = vmatprep.mubr.bf16.mxu0 %v606_v28  ;;  %334 = vmatprep.mubr.bf16.mxu1 %v608_v29 }
  0x3a   :  { %303 = vmatmul.mubr.bf16.gmra.mrb[12].mxu0 %v610_v30  ;;  %335 = vmatmul.mubr.bf16.gmra.mrb[12].mxu1 %v611_v31 }
  0xf5   :  { %v508_v32 = vpop.f32.mrb[0].mxu0  ;;  %v532_v33 = vpop.f32.mrb[0].mxu1 }
  0xf6   :  { %v509_v35 = vpop.f32.mrb[1].mxu0  ;;  %v533_v36 = vpop.f32.mrb[1].mxu1 }
  0xf7   :  { %v510_v37 = vadd.f32 %v509_v35, %v508_v32  ;;  %v534_v38 = vadd.f32 %v533_v36, %v532_v33  ;;  %v511_v39 = vpop.f32.mrb[2].mxu0  ;;  %v535_v40 = vpop.f32.mrb[2].mxu1 }
  0xf8   :  { %v512_v41 = vpop.f32.mrb[3].mxu0  ;;  %v536_v42 = vpop.f32.mrb[3].mxu1 }
  0xf9   :  { %v281_v43 = vadd.f32 %v510_v37, %v795_v34  ;;  %v313_v44 = vadd.f32 %v534_v38, %v795_v34  ;;  %v513_v45 = vadd.f32 %v512_v41, %v511_v39  ;;  %v537_v46 = vadd.f32 %v536_v42, %v535_v40 }
  0xfb   :  { %v343_v47 = vsub.f32 0.0, %v281_v43  ;;  %v351_v48 = vsub.f32 0.0, %v313_v44  ;;  %v284_v49 = vadd.f32 %v513_v45, %v795_v34  ;;  %v316_v50 = vadd.f32 %v537_v46, %v795_v34 }
  0xfd   :  { %v359_v51 = vmul.f32 1.442695, %v343_v47  ;;  %v375_v52 = vmul.f32 1.442695, %v351_v48  ;;  %v344_v53 = vsub.f32 0.0, %v284_v49  ;;  %v352_v54 = vsub.f32 0.0, %v316_v50 }
  0xfe   :  { %v514_v55 = vpop.f32.mrb[4].mxu0  ;;  %v538_v56 = vpop.f32.mrb[4].mxu1 }
  0xff   :  { %612 = vpow2.f32 %v359_v51  ;;  %v361_v57 = vmul.f32 1.442695, %v344_v53  ;;  %v377_v58 = vmul.f32 1.442695, %v352_v54  ;;  %v515_v59 = vpop.f32.mrb[5].mxu0  ;;  %v539_v60 = vpop.f32.mrb[5].mxu1 }
 0x100   :  { %614 = vpow2.f32 %v375_v52  ;;  %v516_v61 = vadd.f32 %v515_v59, %v514_v55  ;;  %v540_v62 = vadd.f32 %v539_v60, %v538_v56  ;;  %v517_v63 = vpop.f32.mrb[6].mxu0  ;;  %v541_v0 = vpop.f32.mrb[6].mxu1 }
 0x101   :  { %616 = vpow2.f32 %v361_v57  ;;  %v518_v1 = vpop.f32.mrb[7].mxu0  ;;  %v542_v2 = vpop.f32.mrb[7].mxu1 }
 0x102   :  { %618 = vpow2.f32 %v377_v58  ;;  %v289_v3 = vadd.f32 %v516_v61, %v795_v34  ;;  %v321_v4 = vadd.f32 %v540_v62, %v795_v34  ;;  %v519_v5 = vadd.f32 %v518_v1, %v517_v63 }
 0x103   :  { %v543_v6 = vadd.f32 %v542_v2, %v541_v0 }
 0x104   :  { %v345_v7 = vsub.f32 0.0, %v289_v3  ;;  %v353_v8 = vsub.f32 0.0, %v321_v4  ;;  %v292_v9 = vadd.f32 %v519_v5, %v795_v34 }
 0x105   :  { %v324_v10 = vadd.f32 %v543_v6, %v795_v34  ;;  %v520_v11 = vpop.f32.mrb[8].mxu0  ;;  %v544_v12 = vpop.f32.mrb[8].mxu1 }
 0x106   :  { %v363_v13 = vmul.f32 1.442695, %v345_v7  ;;  %v379_v14 = vmul.f32 1.442695, %v353_v8  ;;  %v346_v15 = vsub.f32 0.0, %v292_v9  ;;  %v521_v16 = vpop.f32.mrb[9].mxu0 }
 0x107   :  { %v354_v17 = vsub.f32 0.0, %v324_v10  ;;  %v522_v18 = vadd.f32 %v521_v16, %v520_v11  ;;  %v545_v19 = vpop.f32.mrb[9].mxu1  ;;  %v523_v20 = vpop.f32.mrb[10].mxu0 }
 0x108   :  { %620 = vpow2.f32 %v363_v13  ;;  %v365_v21 = vmul.f32 1.442695, %v346_v15  ;;  %v546_v22 = vadd.f32 %v545_v19, %v544_v12  ;;  %v547_v23 = vpop.f32.mrb[10].mxu1  ;;  %v524_v24 = vpop.f32.mrb[11].mxu0 }
 0x109   :  { %v613_v25 = vpop.eup %612  ;;  %622 = vpow2.f32 %v379_v14  ;;  %v381_v26 = vmul.f32 1.442695, %v354_v17  ;;  %v297_v27 = vadd.f32 %v522_v18, %v795_v34  ;;  %v525_v28 = vadd.f32 %v524_v24, %v523_v20  ;;  %v548_v29 = vpop.f32.mrb[11].mxu1 }
 0x10a   :  { %v615_v30 = vpop.eup %614  ;;  %v391_v31 = vadd.f32 1.0, %v613_v25  ;;  %624 = vpow2.f32 %v365_v21  ;;  %v329_v32 = vadd.f32 %v546_v22, %v795_v34  ;;  %v549_v33 = vadd.f32 %v548_v29, %v547_v23 }
 0x10b   :  { %v617_v35 = vpop.eup %616  ;;  %v399_v36 = vadd.f32 1.0, %v615_v30  ;;  %626 = vpow2.f32 %v381_v26  ;;  %v347_v37 = vsub.f32 0.0, %v297_v27  ;;  %v300_v38 = vadd.f32 %v525_v28, %v795_v34 }
 0x10c   :  { %v619_v39 = vpop.eup %618  ;;  %628 = vrcp.f32 %v391_v31  ;;  %v392_v40 = vadd.f32 1.0, %v617_v35  ;;  %v355_v41 = vsub.f32 0.0, %v329_v32  ;;  %v332_v42 = vadd.f32 %v549_v33, %v795_v34 }
 0x10d   :  { %630 = vrcp.f32 %v399_v36  ;;  %v400_v43 = vadd.f32 1.0, %v619_v39  ;;  %v367_v44 = vmul.f32 1.442695, %v347_v37  ;;  %v348_v45 = vsub.f32 0.0, %v300_v38  ;;  %v526_v46 = vpop.f32.mrb[12].mxu0  ;;  %v550_v47 = vpop.f32.mrb[12].mxu1 }
 0x10e   :  { %632 = vrcp.f32 %v392_v40  ;;  %v383_v48 = vmul.f32 1.442695, %v355_v41  ;;  %v356_v49 = vsub.f32 0.0, %v332_v42  ;;  %v527_v50 = vpop.f32.mrb[13].mxu0  ;;  %v551_v51 = vpop.f32.mrb[13].mxu1 }
 0x10f   :  { %634 = vrcp.f32 %v400_v43  ;;  %v369_v52 = vmul.f32 1.442695, %v348_v45  ;;  %v528_v53 = vadd.f32 %v527_v50, %v526_v46  ;;  %v552_v54 = vadd.f32 %v551_v51, %v550_v47  ;;  %v529_v55 = vpop.f32.mrb[14].mxu0  ;;  %v553_v56 = vpop.f32.mrb[14].mxu1 }
 0x110   :  { %636 = vpow2.f32 %v367_v44  ;;  %v385_v57 = vmul.f32 1.442695, %v356_v49  ;;  %v530_v58 = vpop.f32.mrb[15].mxu0  ;;  %v554_v59 = vpop.f32.mrb[15].mxu1 }
 0x111   :  { %638 = vpow2.f32 %v383_v48  ;;  %v305_v60 = vadd.f32 %v528_v53, %v795_v34  ;;  %v337_v61 = vadd.f32 %v552_v54, %v795_v34  ;;  %v531_v62 = vadd.f32 %v530_v58, %v529_v55 }
 0x112   :  { %v621_v63 = vpop.eup %620  ;;  %640 = vpow2.f32 %v369_v52  ;;  %v555_v0 = vadd.f32 %v554_v59, %v553_v56 }
 0x113   :  { %v623_v1 = vpop.eup %622  ;;  %v393_v2 = vadd.f32 1.0, %v621_v63  ;;  %642 = vpow2.f32 %v385_v57  ;;  %v349_v3 = vsub.f32 0.0, %v305_v60  ;;  %v357_v4 = vsub.f32 0.0, %v337_v61 }
 0x114   :  { %v625_v5 = vpop.eup %624  ;;  %v401_v6 = vadd.f32 1.0, %v623_v1  ;;  %v308_v7 = vadd.f32 %v531_v62, %v795_v34  ;;  %v340_v8 = vadd.f32 %v555_v0, %v795_v34 }
 0x115   :  { %v627_v9 = vpop.eup %626  ;;  %644 = vrcp.f32 %v393_v2  ;;  %v394_v10 = vadd.f32 1.0, %v625_v5  ;;  %v371_v11 = vmul.f32 1.442695, %v349_v3  ;;  %v387_v12 = vmul.f32 1.442695, %v357_v4 }
 0x116   :  { %v629_v13 = vpop.eup %628  ;;  %646 = vrcp.f32 %v401_v6  ;;  %v402_v14 = vadd.f32 1.0, %v627_v9  ;;  %v350_v15 = vsub.f32 0.0, %v308_v7  ;;  %v358_v16 = vsub.f32 0.0, %v340_v8 }
 0x117   :  { %v631_v17 = vpop.eup %630  ;;  %439 = vst [vmem:[%s864_s3] sm:$0xff] %v629_v13  ;;  %648 = vrcp.f32 %v394_v10 }
 0x118   :  { %v633_v18 = vpop.eup %632  ;;  %447 = vst [vmem:[%s864_s3 + $0x40] sm:$0xff] %v631_v17  ;;  %650 = vrcp.f32 %v402_v14  ;;  %v373_v34 = vmul.f32 1.442695, %v350_v15  ;;  %v389_v19 = vmul.f32 1.442695, %v358_v16 }
 0x119   :  { %v635_v20 = vpop.eup %634  ;;  %440 = vst [vmem:[%s864_s3 + $0x8] sm:$0xff] %v633_v18  ;;  %652 = vpow2.f32 %v371_v11 }
 0x11a   :  { %v637_v21 = vpop.eup %636  ;;  %448 = vst [vmem:[%s864_s3 + $0x48] sm:$0xff] %v635_v20  ;;  %654 = vpow2.f32 %v387_v12 }
 0x11b   :  { %v639_v22 = vpop.eup %638  ;;  %v395_v23 = vadd.f32 1.0, %v637_v21  ;;  %656 = vpow2.f32 %v373_v34 }
 0x11c   :  { %v641_v24 = vpop.eup %640  ;;  %v403_v25 = vadd.f32 1.0, %v639_v22  ;;  %658 = vpow2.f32 %v389_v19 }
 0x11d   :  { %v643_v26 = vpop.eup %642  ;;  %660 = vrcp.f32 %v395_v23  ;;  %v396_v27 = vadd.f32 1.0, %v641_v24 }
 0x11e   :  { %662 = vrcp.f32 %v403_v25  ;;  %v404_v28 = vadd.f32 1.0, %v643_v26 }
 0x11f   :  { %v645_v29 = vpop.eup %644  ;;  %664 = vrcp.f32 %v396_v27 }
 0x120   :  { %v647_v30 = vpop.eup %646  ;;  %441 = vst [vmem:[%s864_s3 + $0x10] sm:$0xff] %v645_v29  ;;  %666 = vrcp.f32 %v404_v28 }
 0x121   :  { %v649_v31 = vpop.eup %648  ;;  %449 = vst [vmem:[%s864_s3 + $0x50] sm:$0xff] %v647_v30 }
 0x122   :  { %v651_v32 = vpop.eup %650  ;;  %442 = vst [vmem:[%s864_s3 + $0x18] sm:$0xff] %v649_v31 }
 0x123   :  { %v653_v33 = vpop.eup %652  ;;  %450 = vst [vmem:[%s864_s3 + $0x58] sm:$0xff] %v651_v32 }
 0x124   :  { %v655_v35 = vpop.eup %654  ;;  %v397_v36 = vadd.f32 1.0, %v653_v33 }
 0x125   :  { %v657_v37 = vpop.eup %656  ;;  %v405_v38 = vadd.f32 1.0, %v655_v35 }
 0x126   :  { %v659_v39 = vpop.eup %658  ;;  %668 = vrcp.f32 %v397_v36  ;;  %v398_v40 = vadd.f32 1.0, %v657_v37 }
 0x127   :  { %v661_v41 = vpop.eup %660  ;;  %670 = vrcp.f32 %v405_v38  ;;  %v406_v42 = vadd.f32 1.0, %v659_v39 }
 0x128   :  { %v663_v43 = vpop.eup %662  ;;  %443 = vst [vmem:[%s864_s3 + $0x20] sm:$0xff] %v661_v41  ;;  %672 = vrcp.f32 %v398_v40 }
 0x129   :  { %v665_v44 = vpop.eup %664  ;;  %451 = vst [vmem:[%s864_s3 + $0x60] sm:$0xff] %v663_v43  ;;  %674 = vrcp.f32 %v406_v42 }
 0x12a   :  { %v667_v45 = vpop.eup %666  ;;  %444 = vst [vmem:[%s864_s3 + $0x28] sm:$0xff] %v665_v44 }
 0x12b   :  { %452 = vst [vmem:[%s864_s3 + $0x68] sm:$0xff] %v667_v45 }
 0x130   :  { %v669_v46 = vpop.eup %668 }
 0x131   :  { %v671_v47 = vpop.eup %670  ;;  %445 = vst [vmem:[%s864_s3 + $0x30] sm:$0xff] %v669_v46 }
 0x132   :  { %v673_v48 = vpop.eup %672  ;;  %453 = vst [vmem:[%s864_s3 + $0x70] sm:$0xff] %v671_v47 }
 0x133   :  { %v675_v49 = vpop.eup %674  ;;  %446 = vst [vmem:[%s864_s3 + $0x38] sm:$0xff] %v673_v48 }
 0x134   :  { %454 = vst [vmem:[%s864_s3 + $0x78] sm:$0xff] %v675_v49 }

</bundles_post_ra>
